<compile_context>
chip_gen: v7x
topology: tpu7x:2x2x1
jax: 0.10.0
libtpu: 0.0.40
codegen_flags: <defaults>
</compile_context>

<pallas_src>
import functools
import numpy as np
import jax
import jax.numpy as jnp
from jax.experimental import pallas as pl
from jax.experimental.pallas import tpu as pltpu


def _round_up(x, m):
    return (x + m - 1) // m * m


# ---------------------------------------------------------------------------
# so(3) Lie-algebra generators (same as the PyTorch create_gen / LieBracketNorm)
# ---------------------------------------------------------------------------
def create_gen(channels: int) -> np.ndarray:
    genX = np.array([[0, 0, 0], [0, 0, -1], [0, 1, 0]], dtype=np.float32)
    genY = np.array([[0, 0, 1], [0, 0, 0], [-1, 0, 0]], dtype=np.float32)
    genZ = np.array([[0, -1, 0], [1, 0, 0], [0, 0, 0]], dtype=np.float32)

    def blockdiag(g):
        out = np.zeros((3 * channels, 3 * channels), dtype=np.float32)
        for i in range(channels):
            out[3 * i:3 * i + 3, 3 * i:3 * i + 3] = g
        return out

    in_bl = np.concatenate(
        [blockdiag(genX), blockdiag(genY), blockdiag(genZ)], axis=0)  # [9C, 3C]
    return in_bl.T                                                    # [3C, 9C]


def lie_gens(channels: int) -> np.ndarray:
    """G_r[k, p] = create_gen(C)[k, p*3 + r] (the reshape(-1,3C,3).permute slices)."""
    G = create_gen(channels)                                     # [3C, 9C]
    return np.stack([G[:, r::3] for r in range(3)], axis=0)      # [3, 3C, 3C]


# ---------------------------------------------------------------------------
# Pallas kernels
# ---------------------------------------------------------------------------
def _vn_dual_kernel(x_ref, w_ref, b_ref, proj_ref, out_ref, ld_ref, nrm_ref, *, S):
    """Non-equivariant branch: one wide MXU matmul per tile.
         res = Wcat @ x + bcat           res: [5S, tn] (f32 accumulation)
       slab 0 = W1e@x, slab 1 = z = W2@x+b2, slabs 2..4 = Lie-bracket deltas.
       x_out = slab0 + proj*slab1 (proj comes in as an SMEM scalar)."""
    res = jnp.dot(w_ref[...], x_ref[...], preferred_element_type=jnp.float32)
    res = res + b_ref[...]                               # f32 bias column broadcast

    z = res[S:2 * S, :]                                  # Wx + b2  (8-aligned slice)
    d = res[2 * S:, :]                                   # WA - AW  (8-aligned slice)

    proj = proj_ref[0]                                   # SMEM scalar
    out_ref[...] = (res[:S, :] + proj * z).astype(out_ref.dtype)   # full padded slab

    # Per-column partial sums only (sublane reduce); cross-lane/global reduce
    # happens in the wrapper, so both grid axes stay "parallel".
    nrm_ref[...] = jnp.sum(z * z, axis=0, keepdims=True)
    ld_ref[...] = jnp.sum(d * d, axis=0, keepdims=True)


def _vn_equiv_kernel(x_ref, w_ref, out_ref):
    """Equivariant branch: x_out = map_to_feat(x) only."""
    out_ref[...] = jnp.dot(w_ref[...], x_ref[...],
                           preferred_element_type=jnp.float32).astype(out_ref.dtype)


# ---------------------------------------------------------------------------
# Wrapper (parameter setup + call-invariant weight folding in plain JAX)
# ---------------------------------------------------------------------------
class VNLinearDualPallas:
    def __init__(self, in_channels, out_channels, key, out_dtype=jnp.bfloat16):
        self.cin, self.cout = in_channels, out_channels
        self.out_dtype = out_dtype
        k1, k2, k3 = jax.random.split(key, 3)
        b1 = 1.0 / np.sqrt(in_channels)
        b2b = 1.0 / np.sqrt(3 * in_channels)
        # nn.Linear-style deterministic init
        self.W1 = jax.random.uniform(k1, (out_channels, in_channels),
                                     jnp.float32, -b1, b1)
        self.W2 = jax.random.uniform(k2, (3 * out_channels, 3 * in_channels),
                                     jnp.float32, -b2b, b2b)
        self.b2 = jax.random.uniform(k3, (3 * out_channels,),
                                     jnp.float32, -b2b, b2b)

        c3i, c3o = 3 * in_channels, 3 * out_channels
        S = _round_up(c3o, 8)                 # sublane-aligned row-slab size
        self.S = S

        # map_to_feat expanded to the flattened (channel, xyz) row basis:
        #   W1e[co*3+e, ci*3+d] = W1[co, ci] * (e == d)
        W1e = jnp.einsum('oc,ed->oecd', self.W1,
                         jnp.eye(3, dtype=jnp.float32)).reshape(c3o, c3i)

        # Lie-bracket operators folded into plain matrices:
        #   D_r  = W2 @ Gin_r^T - Gout_r^T @ W2      bd_r = b2 - Gout_r^T @ b2
        Gin = jnp.asarray(lie_gens(in_channels))        # [3, 3Cin, 3Cin]
        Gout = jnp.asarray(lie_gens(out_channels))      # [3, 3Cout, 3Cout]
        D = [self.W2 @ Gin[r].T - Gout[r].T @ self.W2 for r in range(3)]
        bd = [self.b2 - Gout[r].T @ self.b2 for r in range(3)]

        def pad_rows(a):
            p = S - a.shape[0]
            return a if p == 0 else jnp.pad(a, [(0, p)] + [(0, 0)] * (a.ndim - 1))

        # Call-invariant fused stacks (proj is applied in-kernel, so these never
        # get rebuilt per call):  [W1e | W2 | D0 | D1 | D2], [0 | b2 | bd0..bd2]
        self.Wcat = jnp.concatenate(
            [pad_rows(W1e), pad_rows(self.W2)] + [pad_rows(Dr) for Dr in D],
            axis=0).astype(jnp.bfloat16)                                  # [5S, 3Cin]
        self.bcat = jnp.concatenate(
            [jnp.zeros((S,), jnp.float32), pad_rows(self.b2)]
            + [pad_rows(b) for b in bd])[:, None]                         # [5S, 1] f32
        self.W1e_bf16 = W1e.astype(jnp.bfloat16)        # equivariant-branch weight

    # --- VMEM budgeting -----------------------------------------------------
    def _vmem_estimate(self, tn):
        c3i, S = 3 * self.cin, self.S
        ob = jnp.dtype(self.out_dtype).itemsize
        return (2 * c3i * tn * 2                     # x tile (bf16), double buffered
                + 2 * S * tn * ob                    # out tile, double buffered
                + 2 * 2 * tn * 4                     # ld/nrm partial tiles
                + 2 * (5 * S * c3i * 2 + 5 * S * 4)  # Wcat / bcat buffers
                + 5 * S * tn * 4)                    # f32 `res` temporary

    def _pick_tile(self, n):
        budget = 20 << 20                            # safe on v5e/v6e/v7x
        cands = [t for t in (1024, 512, 256, 128)
                 if self._vmem_estimate(t) <= budget] or [128]
        best = None
        for t in cands:                              # minimize padding, then max tile
            npad = _round_up(n, t)
            if best is None or npad < best[0] or (npad == best[0] and t > best[1]):
                best = (npad, t)
        return best[1]

    # --- forward --------------------------------------------------------------
    def __call__(self, x, equiv, proj):
        B, Cin, three, N = x.shape
        assert Cin == self.cin and three == 3
        Cout, S = self.cout, self.S
        c3i, c3o = 3 * Cin, 3 * Cout
        ob = jnp.dtype(self.out_dtype).itemsize

        # [B, Cin, 3, N] -> [B, 3Cin, N]: free reshape, N stays on the lane axis.
        x3 = x.reshape(B, c3i, N)
        if x3.dtype != jnp.bfloat16:
            # Ideally the producer already hands us bf16 (halves the x HBM read).
            x3 = x3.astype(jnp.bfloat16)

        tn = self._pick_tile(N)
        n_pad = _round_up(N, tn)
        if n_pad != N:
            x3 = jnp.pad(x3, ((0, 0), (0, 0), (0, n_pad - N)))
        nblk = n_pad // tn

        vmem_limit = int(min(48 << 20, max(32 << 20, 2 * self._vmem_estimate(tn))))

        if equiv:
            out_pad = pl.pallas_call(
                _vn_equiv_kernel,
                out_shape=jax.ShapeDtypeStruct((B, c3o, n_pad), self.out_dtype),
                grid=(B, nblk),
                in_specs=[pl.BlockSpec((None, c3i, tn), lambda b, j: (b, 0, j)),
                          pl.BlockSpec((c3o, c3i), lambda b, j: (0, 0))],
                out_specs=pl.BlockSpec((None, c3o, tn), lambda b, j: (b, 0, j)),
                compiler_params=pltpu.CompilerParams(
                    dimension_semantics=("parallel", "parallel"),
                    vmem_limit_bytes=vmem_limit),
                cost_estimate=pl.CostEstimate(
                    flops=int(2 * B * n_pad * c3o * c3i), transcendentals=0,
                    bytes_accessed=int(B * n_pad * (2 * c3i + ob * c3o)
                                       + 2 * c3o * c3i)),
            )(x3, self.W1e_bf16)
            if n_pad != N:
                out_pad = out_pad[:, :, :N]
            return (out_pad.reshape(B, Cout, 3, N),
                    jnp.float32(0.0), jnp.float32(0.0))

        proj_arr = jnp.reshape(jnp.asarray(proj, jnp.float32), (1,))

        # NOTE: on v7x with large channel counts, pipeline_mode=pl.Buffered(1) on
        # the Wcat/bcat specs (constant index map) reclaims their second buffer.
        out_pad, ld_p, nrm_p = pl.pallas_call(
            functools.partial(_vn_dual_kernel, S=S),
            out_shape=(jax.ShapeDtypeStruct((B, S, n_pad), self.out_dtype),
                       jax.ShapeDtypeStruct((B, nblk, 1, tn), jnp.float32),
                       jax.ShapeDtypeStruct((B, nblk, 1, tn), jnp.float32)),
            grid=(B, nblk),
            in_specs=[pl.BlockSpec((None, c3i, tn), lambda b, j: (b, 0, j)),
                      pl.BlockSpec((5 * S, c3i), lambda b, j: (0, 0)),
                      pl.BlockSpec((5 * S, 1), lambda b, j: (0, 0)),
                      pl.BlockSpec(memory_space=pltpu.MemorySpace.SMEM)],
            out_specs=(pl.BlockSpec((None, S, tn), lambda b, j: (b, 0, j)),
                       pl.BlockSpec((None, None, 1, tn), lambda b, j: (b, j, 0, 0)),
                       pl.BlockSpec((None, None, 1, tn), lambda b, j: (b, j, 0, 0))),
            compiler_params=pltpu.CompilerParams(
                dimension_semantics=("parallel", "parallel"),
                vmem_limit_bytes=vmem_limit),
            cost_estimate=pl.CostEstimate(
                flops=int(2 * B * n_pad * 5 * S * c3i), transcendentals=0,
                bytes_accessed=int(B * n_pad * (2 * c3i + ob * S + 8)
                                   + 5 * S * (2 * c3i + 4))),
        )(x3, self.Wcat, self.bcat, proj_arr)

        if S != c3o or n_pad != N:
            out_pad = out_pad[:, :c3o, :N]           # drop padded rows / columns
        x_out = out_pad.reshape(B, Cout, 3, N)

        if n_pad != N:                               # padded columns excluded here
            ld = jnp.sum(ld_p.reshape(B, n_pad)[:, :N])
            nrm = jnp.sum(nrm_p.reshape(B, n_pad)[:, :N])
        else:
            ld = jnp.sum(ld_p)
            nrm = jnp.sum(nrm_p)
        return x_out, ld, nrm


# ---------------------------------------------------------------------------
# Plain-JAX reference of the PyTorch forward (for a sanity check)
# ---------------------------------------------------------------------------
def reference_forward(x, W1, W2, b2, proj, equiv, Cin, Cout):
    B, _, _, N = x.shape
    xT = jnp.transpose(x, (0, 3, 2, 1))                          # [B,N,3,Cin]
    x_out = jnp.transpose(jnp.einsum('bndc,oc->bndo', xT, W1), (0, 3, 2, 1))
    if equiv:
        return x_out, jnp.float32(0.0), jnp.float32(0.0)
    addW = jnp.transpose(x.reshape(B, Cin * 3, N), (0, 2, 1))    # [B,N,3Cin]
    z = addW @ W2.T + b2                                         # Wx
    z_unf = jnp.transpose(z, (0, 2, 1)).reshape(B, Cout, 3, N)
    x_out = x_out + proj * z_unf
    Gin = jnp.asarray(create_gen(Cin))
    Gout = jnp.asarray(create_gen(Cout))
    xa = jnp.transpose((addW @ Gin).reshape(-1, 3 * Cin, 3), (0, 2, 1))
    WA = xa @ W2.T + b2
    AW = jnp.transpose((z @ Gout).reshape(-1, 3 * Cout, 3), (0, 2, 1))
    return x_out, jnp.sum((WA - AW) ** 2), jnp.sum(z ** 2)


if __name__ == "__main__":
    key = jax.random.PRNGKey(0)
    kx, kp = jax.random.split(key)
    B, Cin, Cout, N = 2, 4, 8, 1024
    x = jax.random.normal(kx, (B, Cin, 3, N), dtype=jnp.float32)
    x_bf = x.astype(jnp.bfloat16)          # one-off producer-side cast (bf16 HBM reads)
    proj = 0.5

    mod = VNLinearDualPallas(Cin, Cout, kp)

    # non-equivariant branch (dense dual path + Lie-bracket norms)
    x_out, ld, nrm = mod(x_bf, equiv=False, proj=proj)
    jax.block_until_ready((x_out, ld, nrm))

    # equivariant branch (map_to_feat only)
    x_out_eq, ld_eq, nrm_eq = mod(x_bf, equiv=True, proj=proj)
    jax.block_until_ready(x_out_eq)

    # sanity check against a plain-JAX f32 transcription of the PyTorch math
    # (bf16 activations/weights + bf16 x_out store -> loose per-element tolerance)
    r_out, r_ld, r_nrm = reference_forward(x, mod.W1, mod.W2, mod.b2, proj,
                                           False, Cin, Cout)
    r_out_eq, _, _ = reference_forward(x, mod.W1, mod.W2, mod.b2, proj,
                                       True, Cin, Cout)
    assert jnp.allclose(x_out.astype(jnp.float32), r_out, rtol=5e-2, atol=5e-2)
    assert jnp.allclose(x_out_eq.astype(jnp.float32), r_out_eq, rtol=5e-2, atol=5e-2)
    assert jnp.allclose(ld, r_ld, rtol=2.5e-2)
    assert jnp.allclose(nrm, r_nrm, rtol=2.5e-2)

    # ragged N (not a multiple of 128) exercises the pad + wrapper-slice path
    N2 = 200
    x2 = jax.random.normal(jax.random.PRNGKey(1), (B, Cin, 3, N2), jnp.float32)
    o2, ld2, nrm2 = mod(x2.astype(jnp.bfloat16), equiv=False, proj=proj)
    jax.block_until_ready((o2, ld2, nrm2))
    r2_out, r2_ld, r2_nrm = reference_forward(x2, mod.W1, mod.W2, mod.b2, proj,
                                              False, Cin, Cout)
    assert jnp.allclose(o2.astype(jnp.float32), r2_out, rtol=5e-2, atol=5e-2)
    assert jnp.allclose(ld2, r2_ld, rtol=2.5e-2)
    assert jnp.allclose(nrm2, r2_nrm, rtol=2.5e-2)

    print("KERNEL_OK")
</pallas_src>

<mosaic_0001>
module attributes {stable_mosaic.version = 11 : i64} {
  func.func @_vn_dual_kernel(%arg0: i32, %arg1: i32, %arg2: memref<1x12x1024xbf16, #tpu.memory_space<vmem>>, %arg3: memref<120x12xbf16, #tpu.memory_space<vmem>>, %arg4: memref<120x1xf32, #tpu.memory_space<vmem>>, %arg5: memref<1xf32, #tpu.memory_space<smem>>, %arg6: memref<1x24x1024xbf16, #tpu.memory_space<vmem>>, %arg7: memref<1x1x1x1024xf32, #tpu.memory_space<vmem>>, %arg8: memref<1x1x1x1024xf32, #tpu.memory_space<vmem>>) attributes {dimension_semantics = [#tpu.dimension_semantics<parallel>, #tpu.dimension_semantics<parallel>], iteration_bounds = array<i64: 2, 1>, scalar_prefetch = 0 : i64, scratch_operands = 0 : i64, tpu.core_type = #tpu.core_type<tc>, window_params = [{transform_indices = @transform_0, window_bounds = array<i64: 1, 12, 1024>}, {pipeline_mode = #tpu.pipeline_mode<synchronous>, transform_indices = @transform_1, window_bounds = array<i64: 120, 12>}, {pipeline_mode = #tpu.pipeline_mode<synchronous>, transform_indices = @transform_2, window_bounds = array<i64: 120, 1>}, {transform_indices = @transform_3, window_bounds = array<i64: 1>}, {transform_indices = @transform_4, window_bounds = array<i64: 1, 24, 1024>}, {transform_indices = @transform_5, window_bounds = array<i64: 1, 1, 1, 1024>}, {transform_indices = @transform_6, window_bounds = array<i64: 1, 1, 1, 1024>}]} {
    %c0 = arith.constant 0 : index
    %c0_0 = arith.constant 0 : index
    %0 = vector.load %arg3[%c0, %c0_0] : memref<120x12xbf16, #tpu.memory_space<vmem>>, vector<120x12xbf16>
    %c0_1 = arith.constant 0 : index
    %c0_2 = arith.constant 0 : index
    %c0_3 = arith.constant 0 : index
    %1 = vector.load %arg2[%c0_1, %c0_2, %c0_3] : memref<1x12x1024xbf16, #tpu.memory_space<vmem>>, vector<1x12x1024xbf16>
    %2 = vector.shape_cast %1 : vector<1x12x1024xbf16> to vector<12x1024xbf16>
    %cst = arith.constant dense<0.000000e+00> : vector<120x1024xf32>
    %3 = tpu.matmul %0, %2, %cst {dimension_numbers = #tpu.dot_dimension_numbers<[1], [0], [0], [1], [0, 0, 1, 1], [], []>} : vector<120x12xbf16>, vector<12x1024xbf16>, vector<120x1024xf32> -> vector<120x1024xf32>
    %c0_4 = arith.constant 0 : index
    %c0_5 = arith.constant 0 : index
    %4 = vector.load %arg4[%c0_4, %c0_5] : memref<120x1xf32, #tpu.memory_space<vmem>>, vector<120x1xf32>
    %5 = vector.broadcast %4 : vector<120x1xf32> to vector<120x1024xf32>
    %6 = arith.addf %3, %5 : vector<120x1024xf32>
    %7 = vector.extract_strided_slice %6 {offsets = [24, 0], sizes = [24, 1024], strides = [1, 1]} : vector<120x1024xf32> to vector<24x1024xf32>
    %8 = vector.extract_strided_slice %6 {offsets = [48, 0], sizes = [72, 1024], strides = [1, 1]} : vector<120x1024xf32> to vector<72x1024xf32>
    %c0_6 = arith.constant 0 : index
    %9 = memref.load %arg5[%c0_6] : memref<1xf32, #tpu.memory_space<smem>>
    %10 = vector.extract_strided_slice %6 {offsets = [0, 0], sizes = [24, 1024], strides = [1, 1]} : vector<120x1024xf32> to vector<24x1024xf32>
    %11 = vector.broadcast %9 : f32 to vector<24x1024xf32>
    %12 = arith.mulf %11, %7 : vector<24x1024xf32>
    %13 = arith.addf %10, %12 : vector<24x1024xf32>
    %14 = arith.truncf %13 : vector<24x1024xf32> to vector<24x1024xbf16>
    %c0_7 = arith.constant 0 : index
    %c0_8 = arith.constant 0 : index
    %c0_9 = arith.constant 0 : index
    %15 = vector.load %arg6[%c0_7, %c0_8, %c0_9] : memref<1x24x1024xbf16, #tpu.memory_space<vmem>>, vector<1x24x1024xbf16>
    %16 = vector.shape_cast %15 : vector<1x24x1024xbf16> to vector<24x1024xbf16>
    %17 = vector.shape_cast %14 : vector<24x1024xbf16> to vector<1x24x1024xbf16>
    tpu.vector_store %arg6[%c0_7, %c0_8, %c0_9], %17 {strides = array<i32>} : memref<1x24x1024xbf16, #tpu.memory_space<vmem>>, vector<1x24x1024xbf16>,
    %18 = arith.mulf %7, %7 : vector<24x1024xf32>
    %cst_10 = arith.constant dense<0.000000e+00> : vector<1024xf32>
    %19 = vector.multi_reduction <add>, %18, %cst_10 [0] : vector<24x1024xf32> to vector<1024xf32>
    %20 = vector.shape_cast %19 : vector<1024xf32> to vector<1x1024xf32>
    %c0_11 = arith.constant 0 : index
    %c0_12 = arith.constant 0 : index
    %c0_13 = arith.constant 0 : index
    %c0_14 = arith.constant 0 : index
    %21 = vector.load %arg8[%c0_11, %c0_12, %c0_13, %c0_14] : memref<1x1x1x1024xf32, #tpu.memory_space<vmem>>, vector<1x1x1x1024xf32>
    %22 = vector.shape_cast %21 : vector<1x1x1x1024xf32> to vector<1x1024xf32>
    %23 = vector.shape_cast %20 : vector<1x1024xf32> to vector<1x1x1x1024xf32>
    tpu.vector_store %arg8[%c0_11, %c0_12, %c0_13, %c0_14], %23 {strides = array<i32>} : memref<1x1x1x1024xf32, #tpu.memory_space<vmem>>, vector<1x1x1x1024xf32>,
    %24 = arith.mulf %8, %8 : vector<72x1024xf32>
    %cst_15 = arith.constant dense<0.000000e+00> : vector<1024xf32>
    %25 = vector.multi_reduction <add>, %24, %cst_15 [0] : vector<72x1024xf32> to vector<1024xf32>
    %26 = vector.shape_cast %25 : vector<1024xf32> to vector<1x1024xf32>
    %c0_16 = arith.constant 0 : index
    %c0_17 = arith.constant 0 : index
    %c0_18 = arith.constant 0 : index
    %c0_19 = arith.constant 0 : index
    %27 = vector.load %arg7[%c0_16, %c0_17, %c0_18, %c0_19] : memref<1x1x1x1024xf32, #tpu.memory_space<vmem>>, vector<1x1x1x1024xf32>
    %28 = vector.shape_cast %27 : vector<1x1x1x1024xf32> to vector<1x1024xf32>
    %29 = vector.shape_cast %26 : vector<1x1024xf32> to vector<1x1x1x1024xf32>
    tpu.vector_store %arg7[%c0_16, %c0_17, %c0_18, %c0_19], %29 {strides = array<i32>} : memref<1x1x1x1024xf32, #tpu.memory_space<vmem>>, vector<1x1x1x1024xf32>,
    return
  }
  func.func @transform_0(%arg0: i32, %arg1: i32) -> (i32, i32, i32) {
    %c0_i32 = arith.constant 0 : i32
    %c0_i32_0 = arith.constant 0 : i32
    return %arg0, %c0_i32, %arg1 : i32, i32, i32
  }
  func.func @transform_1(%arg0: i32, %arg1: i32) -> (i32, i32) {
    %c0_i32 = arith.constant 0 : i32
    %c0_i32_0 = arith.constant 0 : i32
    %c0_i32_1 = arith.constant 0 : i32
    return %c0_i32, %c0_i32_0 : i32, i32
  }
  func.func @transform_2(%arg0: i32, %arg1: i32) -> (i32, i32) {
    %c0_i32 = arith.constant 0 : i32
    %c0_i32_0 = arith.constant 0 : i32
    %c0_i32_1 = arith.constant 0 : i32
    return %c0_i32, %c0_i32_0 : i32, i32
  }
  func.func @transform_3(%arg0: i32, %arg1: i32) -> i32 {
    %c0_i32 = arith.constant 0 : i32
    %c0_i32_0 = arith.constant 0 : i32
    return %c0_i32 : i32
  }
  func.func @transform_4(%arg0: i32, %arg1: i32) -> (i32, i32, i32) {
    %c0_i32 = arith.constant 0 : i32
    %c0_i32_0 = arith.constant 0 : i32
    return %arg0, %c0_i32, %arg1 : i32, i32, i32
  }
  func.func @transform_5(%arg0: i32, %arg1: i32) -> (i32, i32, i32, i32) {
    %c0_i32 = arith.constant 0 : i32
    %c0_i32_0 = arith.constant 0 : i32
    %c0_i32_1 = arith.constant 0 : i32
    return %arg0, %arg1, %c0_i32, %c0_i32_0 : i32, i32, i32, i32
  }
  func.func @transform_6(%arg0: i32, %arg1: i32) -> (i32, i32, i32, i32) {
    %c0_i32 = arith.constant 0 : i32
    %c0_i32_0 = arith.constant 0 : i32
    %c0_i32_1 = arith.constant 0 : i32
    return %arg0, %arg1, %c0_i32, %c0_i32_0 : i32, i32, i32, i32
  }
}

</mosaic_0001>

<bundles_post_ra>
// kernel: tpu_custom_call.1
= control target key start
LH: loop header
LB: loop body
LE: loop exit
PB: predicated region body
PF: predicated region fallthrough
CT: control target
= control target key end

     0   :  { %s2732_s0 = inlined_call_operand.vmem [shape: bf16[2,12,1024], index: 0, kind: input, shape index: {}]   ;;  %s2733_s1 = inlined_call_operand.vmem [shape: bf16[120,12], index: 1, kind: input, shape index: {}]   ;;  %s2734_s2 = inlined_call_operand.vmem [shape: f32[120,1], index: 2, kind: input, shape index: {}]   ;;  %s2735_s3 = inlined_call_operand.<no memory space> [shape: f32[1], index: 3, kind: input, shape index: {}]   ;;  %s2736_s4 = inlined_call_operand.hbm [shape: bf16[2,24,1024], index: 4, kind: output, shape index: {0}]   ;;  %s2737_s5 = inlined_call_operand.hbm [shape: f32[2,1,1,1024], index: 5, kind: output, shape index: {1}]   ;;  %s2738_s6 = inlined_call_operand.hbm [shape: f32[2,1,1,1024], index: 6, kind: output, shape index: {2}]  }
   0x1   :  { %12 = sst [smem:[#allocation2]] %s2735_s3 }
   0x2   :  { %13 = vsyncpa [#allocation4], 0 }
   0x3   :  { %15 = vsyncpa [#allocation4 + $0x1], 0 }
   0x4   :  { %16 = vsyncpa [#allocation6], 0 }
   0x5   :  { %18 = vsyncpa [#allocation6 + $0x1], 0  ;;  %s2081_s23 = smov 0   ;;  %s2083_s24 = smov 0  }
   0x6   :  { %s2085_s25 = smov 0   ;;  %s2087_s26 = smov 0  }
   0x7   :  { %s2089_s27 = smov 0   ;;  %s2091_s28 = smov 0  }
   0x8 LB: > { %s1718_s3 = sadd.s32 4294967295, %s2034_s28   ;;  %s1719_s29 = sadd.s32 4294967294, %s2034_s28   ;;  %s2034_s28 = sphi %s2091_s28, %s24_s28   ;;  %s2030_s27 = sphi %s2089_s27, %s2745_s27   ;;  %s2026_s26 = sphi %s2087_s26, %s2744_s26   ;;  %s2022_s25 = sphi %s2085_s25, %s2743_s25   ;;  %s2018_s24 = sphi %s2083_s24, %s2742_s24   ;;  %s2014_s23 = sphi %s2081_s23, %s2741_s23  }
   0x9   : > { %s36_s30 = sadd.s32 1, %s2030_s27  ;;  %s136_s7 = sadd.s32 1, %s2022_s25 }
   0xa   : > { %p38_p0 = scmp.ge.s32.totalorder %s36_s30, 2  ;;  %p146_p1 = scmp.ne.s32.totalorder %s2022_s25, %s2018_s24 }
   0xb   : > { %p147_p2 = scmp.eq.s32.totalorder %s1718_s3, 1  ;;  %p152_p3 = scmp.ne.s32.totalorder %s2018_s24, %s2014_s23 }
   0xc   : > { %s2747_s30 = smov (%p38_p0, %s36_s30), 0  ;;  %p153_p5 = scmp.eq.s32.totalorder %s1719_s29, 1 }
   0xd   : > { %p2123_p4 = por %p147_p2, %p146_p1  ;;  %s131_s9 = ssub.s32 %s2030_s27, %s2747_s30 }
   0xe   : > { %p1722_p6 = scmp.ge.s32.totalorder %s2034_s28, 1  ;;  %p134_p7 = scmp.eq.s32.totalorder %s131_s9, 0 }
   0xf   : > { %p2132_p8 = por %p153_p5, %p152_p3  ;;  %p249_p9 = scmp.lt.s32.totalorder %s2034_s28, 3 }
  0x10   : > { %s2138_s11 = scalar_select %p134_p7, %s2022_s25, %s136_s7  }
  0x11   : > { %p250_p10 = pnand %p1722_p6, %p249_p9 }
  0x12   : > { %p294_p11 = scmp.lt.s32.totalorder (!%p250_p10), %s2026_s26, 1  ;;  %v2036_v0 = vmov (!%p250_p10), 0   ;;  %vm513_vm0 = vcmask (!%p250_p10), 1045504   ;;  %v2154_v16 = vld [vmem:[%s2733_s1] sm:$0xff] (!%p250_p10)   ;;  %vm488_vm1 = vcmask (!%p250_p10), 97280   ;;  %v334_v21 = vld [vmem:[%s2734_s2 + $0x30] sm:$0xff] (!%p250_p10) }
  0x13   : > { %253 = sbr.rel (%p250_p10) target bundleno = 449 (0x1c1), region = 36  ;;  %570 = vmatprep.mubr.bf16.mxu0 (!%p250_p10), %v2036_v0  ;;  %681 = vmatprep.mubr.bf16.mxu1 (!%p250_p10), %v2036_v0  ;;  %v336_v22 = vld [vmem:[%s2734_s2 + $0x40] sm:$0xff] (!%p250_p10)  ;;  %v335_v24 = vld [vmem:[%s2734_s2 + $0x38] sm:$0xff] (!%p250_p10)  ;;  %v337_v25 = vld [vmem:[%s2734_s2 + $0x48] sm:$0xff] (!%p250_p10)  ;;  %s982_s9 = sld [smem:[#allocation2]] (!%p250_p10) }
  0x14   : > { %1886 = vset.pattern.permute.xlu0 (!%p250_p10), %v2036_v0  ;;  %1887 = vset.pattern.permute.xlu1 (!%p250_p10), %v2036_v0  ;;  %v2183_v26 = vld [vmem:[%s2733_s1 + $0x8] sm:$0xff] (!%p250_p10)   ;;  %v338_v27 = vld [vmem:[%s2734_s2 + $0x50] sm:$0xff] (!%p250_p10)  ;;  %v339_v28 = vld [vmem:[%s2734_s2 + $0x58] sm:$0xff] (!%p250_p10)  ;;  %v2037_v63 = vmov (!%p250_p10), 1966171168   ;;  %s2038_s22 = smov (!%p250_p10), [#allocation3]  }
  0x15   : > { %375 = vperm.xlu0 (!%p250_p10), %1886, %v334_v21   ;;  %385 = vperm.xlu1 (!%p250_p10), %1887, %v336_v22   ;;  %v340_v29 = vld [vmem:[%s2734_s2 + $0x60] sm:$0xff] (!%p250_p10)  ;;  %v341_v30 = vld [vmem:[%s2734_s2 + $0x68] sm:$0xff] (!%p250_p10)  ;;  %v1890_v31 = vld [vmem:[%s2733_s1 + $0x10] sm:$0xff] (!%p250_p10)   ;;  %s1900_s7 = sshll.u32 (!%p250_p10), %s2038_s22, 4  ;;  %s1901_s7 = int_to_ptr.vmem [resolvable:$false] %s1900_s7 }
  0x16   : > { %v331_v32 = vld [vmem:[%s2734_s2 + $0x18] sm:$0xff] (!%p250_p10)  ;;  %v332_v33 = vld [vmem:[%s2734_s2 + $0x20] sm:$0xff] (!%p250_p10)  ;;  %v342_v34 = vld [vmem:[%s2734_s2 + $0x70] sm:$0xff] (!%p250_p10) }
  0x17   : > { %v333_v35 = vld [vmem:[%s2734_s2 + $0x28] sm:$0xff] (!%p250_p10)  ;;  %v1891_v36 = vld [vmem:[%s2733_s1 + $0x18] sm:$0xff] (!%p250_p10)   ;;  %v328_v37 = vld [vmem:[%s2734_s2] sm:$0xff] (!%p250_p10) }
  0x18   : > { %v329_v38 = vld [vmem:[%s2734_s2 + $0x8] sm:$0xff] (!%p250_p10)  ;;  %v330_v39 = vld [vmem:[%s2734_s2 + $0x10] sm:$0xff] (!%p250_p10)  ;;  %v1892_v40 = vld [vmem:[%s2733_s1 + $0x20] sm:$0xff] (!%p250_p10)  }
  0x19   : > { %380 = vperm.xlu0 (!%p250_p10), %1886, %v335_v24   ;;  %390 = vperm.xlu1 (!%p250_p10), %1887, %v337_v25   ;;  %v1893_v41 = vld [vmem:[%s2733_s1 + $0x28] sm:$0xff] (!%p250_p10)   ;;  %v1894_v42 = vld [vmem:[%s2733_s1 + $0x30] sm:$0xff] (!%p250_p10)   ;;  %v1895_v43 = vld [vmem:[%s2733_s1 + $0x38] ss:$0 sps:$4 sm:$0xff] (!%p250_p10)  }
  0x1a   : > { %s295_s12 = scalar_select %p294_p11, %s2026_s26, 1 }
  0x1c   : > { %s1800_s13 = sshll.u32 %s295_s12, 6  ;;  %s2333_s12 = sand.u32 1, %s2018_s24  }
  0x1d   : > { %s301_s16 = scalar_lea.vmem %s2732_s0, %s1800_s13  ;;  %395 = vperm.xlu0 %1886, %v338_v27   ;;  %400 = vperm.xlu1 %1887, %v339_v28   ;;  %s1815_s13 = smul.u32 96, %s2333_s12 }
  0x1e   : > { %v320_v1 = vld [vmem:[%s301_s16] sm:$0xff]  ;;  %v321_v3 = vld [vmem:[%s301_s16 + $0x8] sm:$0xff]  ;;  %v322_v7 = vld [vmem:[%s301_s16 + $0x10] sm:$0xff]  ;;  %s1515_s20 = scalar_lea.sflag [#allocation4], %s2333_s12 }
  0x1f   : > { %v324_v2 = vld [vmem:[%s301_s16 + $0x20] sm:$0x33]  ;;  %v325_v5 = vld [vmem:[%s301_s16 + $0x28] sm:$0x33]  ;;  %v326_v8 = vld [vmem:[%s301_s16 + $0x30] sm:$0x33] }
  0x20   : > { %v1736_v4 = vcombine.high %v320_v1, %v324_v2  ;;  %v1735_v6 = vcombine.low %v320_v1, %v324_v2  ;;  %v1738_v9 = vcombine.high %v321_v3, %v325_v5  ;;  %v1737_v10 = vcombine.low %v321_v3, %v325_v5  ;;  %v323_v12 = vld [vmem:[%s301_s16 + $0x18] sm:$0xff]  ;;  %s2370_s14 = scalar_lea.vmem [#allocation3], %s1815_s13 }
  0x21   : > { %v1740_v11 = vcombine.high %v322_v7, %v326_v8  ;;  %v327_v13 = vld [vmem:[%s301_s16 + $0x38] sm:$0x33]  ;;  %v1739_v14 = vcombine.low %v322_v7, %v326_v8  ;;  %405 = vperm.xlu0 %1886, %v340_v29   ;;  %410 = vperm.xlu1 %1887, %v341_v30   ;;  %v1227_v1 = vlaneseq  ;;  %s1540_s15 = sshll.u32 %s2370_s14, 4  ;;  %s1816_s16 = smul.u32 1536, %s2026_s26  ;;  %s2520_s15 = int_to_ptr.vmem [resolvable:$true] %s1540_s15 }
  0x22   : > { %1743 = vmatprep.subr.msk.bf16.mxu0 %vm513_vm0, %v1736_v4  ;;  %v515_v15 = vsel %vm513_vm0, %v1735_v6, 0  ;;  %v1742_v17 = vcombine.high %v323_v12, %v327_v13  ;;  %v1741_v18 = vcombine.low %v323_v12, %v327_v13  ;;  %1752 = vmatprep.subr.msk.bf16.mxu1 %vm513_vm0, %v1738_v9  ;;  %v521_v19 = vsel %vm513_vm0, %v1737_v10, 0  ;;  %s1896_s21 = scalar_lea.vmem %s2520_s15, 1536  ;;  %p1903_p1 = scmp.lt.s32.totalorder %s2520_s15, %s1901_s7 }
  0x23   : > { %539 = vmatpush1.bf16.msra.mxu0 %v515_v15  ;;  %650 = vmatpush1.bf16.msra.mxu1 %v521_v19  ;;  %v527_v20 = vsel %vm513_vm0, %v1739_v14, 0  ;;  %v1228_v5 = vshrl.u32 %v1227_v1, 7  ;;  %v2330_v12 = vstv %s982_s9  ;;  %s2525_s19 = scalar_lea.hbm %s2736_s4, %s1816_s16  ;;  %p1897_p12 = scmp.ne.s32.totalorder %s2520_s15, %s1896_s21 }
  0x24   : > { %1761 = vmatprep.subr.msk.bf16.mxu0 %vm513_vm0, %v1740_v11  ;;  %1770 = vmatprep.subr.msk.bf16.mxu1 %vm513_vm0, %v1742_v17  ;;  %v533_v23 = vsel %vm513_vm0, %v1741_v18, 0  ;;  %s1902_s9 = scalar_lea.vmem %s1901_s7, 3072 }
  0x25   : > { %360 = vperm.xlu0 %1886, %v331_v32   ;;  %365 = vperm.xlu1 %1887, %v332_v33   ;;  %p1898_p13 = pnand %p1897_p12, %p2123_p4  ;;  %p1904_p2 = scmp.lt.s32.totalorder %s1902_s9, %s1896_s21 }
  0x26   : > { %1744 = vmatmul.mubr.msk.bf16.vlgmr.msra.gmra.mrb[0].mxu0 %vm488_vm1, %v2154_v16  ;;  %1753 = vmatmul.mubr.msk.bf16.vlgmr.msra.gmra.mrb[0].mxu1 %vm488_vm1, %v2154_v16 }
  0x27   : > { %761 = vmatpush1.bf16.msra.mxu0 %v527_v20  ;;  %872 = vmatpush1.bf16.msra.mxu1 %v533_v23  ;;  %p1899_p0 = pneg %p1898_p13  ;;  %p1905_p3 = por %p1904_p2, %p1903_p1 }
  0x28   : > { %580 = vmatprep.mubr.bf16.mxu0 %v2036_v0  ;;  %691 = vmatprep.mubr.bf16.mxu1 %v2036_v0 }
  0x29   : > { %415 = vperm.xlu0 %1886, %v342_v34   ;;  %370 = vperm.xlu1 %1887, %v333_v35   ;;  %p1906_p5 = pnand %p1905_p3, %p1899_p0 }
  0x2d   : > { %345 = vperm.xlu0 %1886, %v328_v37   ;;  %350 = vperm.xlu1 %1887, %v329_v38  }
  0x2e   : > { %1745 = vmatmul.mubr.msk.bf16.gmra.mrb[4].mxu0 %vm488_vm1, %v2183_v26  ;;  %1754 = vmatmul.mubr.msk.bf16.gmra.mrb[4].mxu1 %vm488_vm1, %v2183_v26 }
  0x2f   : > { %590 = vmatprep.mubr.bf16.mxu0 %v2036_v0  ;;  %701 = vmatprep.mubr.bf16.mxu1 %v2036_v0 }
  0x31   : > { %355 = vperm.xlu0 %1886, %v330_v39  }
  0x36   : > { %1746 = vmatmul.mubr.msk.bf16.gmra.mrb[8].mxu0 %vm488_vm1, %v1890_v31  ;;  %1755 = vmatmul.mubr.msk.bf16.gmra.mrb[8].mxu1 %vm488_vm1, %v1890_v31 }
  0x37   : > { %600 = vmatprep.mubr.bf16.mxu0 %v2036_v0  ;;  %711 = vmatprep.mubr.bf16.mxu1 %v2036_v0 }
  0x3e   : > { %1747 = vmatmul.mubr.msk.bf16.gmra.mrb[12].mxu0 %vm488_vm1, %v1891_v36  ;;  %1756 = vmatmul.mubr.msk.bf16.gmra.mrb[12].mxu1 %vm488_vm1, %v1891_v36 }
  0x3f   : > { %610 = vmatprep.mubr.bf16.mxu0 %v2036_v0  ;;  %721 = vmatprep.mubr.bf16.mxu1 %v2036_v0 }
  0x46   : > { %1748 = vmatmul.mubr.msk.bf16.gmra.mrb[16].mxu0 %vm488_vm1, %v1892_v40  ;;  %1757 = vmatmul.mubr.msk.bf16.gmra.mrb[16].mxu1 %vm488_vm1, %v1892_v40 }
  0x47   : > { %620 = vmatprep.mubr.bf16.mxu0 %v2036_v0  ;;  %731 = vmatprep.mubr.bf16.mxu1 %v2036_v0 }
  0x4e   : > { %1749 = vmatmul.mubr.msk.bf16.gmra.mrb[20].mxu0 %vm488_vm1, %v1893_v41  ;;  %1758 = vmatmul.mubr.msk.bf16.gmra.mrb[20].mxu1 %vm488_vm1, %v1893_v41 }
  0x4f   : > { %630 = vmatprep.mubr.bf16.mxu0 %v2036_v0  ;;  %741 = vmatprep.mubr.bf16.mxu1 %v2036_v0 }
  0x56   : > { %1750 = vmatmul.mubr.msk.bf16.gmra.mrb[24].mxu0 %vm488_vm1, %v1894_v42  ;;  %1759 = vmatmul.mubr.msk.bf16.gmra.mrb[24].mxu1 %vm488_vm1, %v1894_v42 }
  0x57   : > { %640 = vmatprep.mubr.bf16.mxu0 %v2036_v0  ;;  %751 = vmatprep.mubr.bf16.mxu1 %v2036_v0 }
  0x5e   : > { %1751 = vmatmul.mubr.msk.bf16.gmra.mrb[28].mxu0 %vm488_vm1, %v1895_v43  ;;  %1760 = vmatmul.mubr.msk.bf16.gmra.mrb[28].mxu1 %vm488_vm1, %v1895_v43 }
  0x5f   : > { %792 = vmatprep.mubr.bf16.mxu0 %v2036_v0  ;;  %903 = vmatprep.mubr.bf16.mxu1 %v2036_v0 }
  0x66   : > { %1762 = vmatmul.mubr.msk.bf16.vlgmr.msra.gmra.mrb[32].mxu0 %vm488_vm1, %v2154_v16  ;;  %1771 = vmatmul.mubr.msk.bf16.vlgmr.msra.gmra.mrb[32].mxu1 %vm488_vm1, %v2154_v16 }
  0x67   : > { %802 = vmatprep.mubr.bf16.mxu0 %v2036_v0  ;;  %913 = vmatprep.mubr.bf16.mxu1 %v2036_v0 }
  0x6e   : > { %1763 = vmatmul.mubr.msk.bf16.gmra.mrb[36].mxu0 %vm488_vm1, %v2183_v26  ;;  %1772 = vmatmul.mubr.msk.bf16.gmra.mrb[36].mxu1 %vm488_vm1, %v2183_v26 }
  0x6f   : > { %812 = vmatprep.mubr.bf16.mxu0 %v2036_v0  ;;  %923 = vmatprep.mubr.bf16.mxu1 %v2036_v0 }
  0x76   : > { %1764 = vmatmul.mubr.msk.bf16.gmra.mrb[40].mxu0 %vm488_vm1, %v1890_v31  ;;  %1773 = vmatmul.mubr.msk.bf16.gmra.mrb[40].mxu1 %vm488_vm1, %v1890_v31 }
  0x77   : > { %822 = vmatprep.mubr.bf16.mxu0 %v2036_v0  ;;  %933 = vmatprep.mubr.bf16.mxu1 %v2036_v0 }
  0x7e   : > { %1765 = vmatmul.mubr.msk.bf16.gmra.mrb[44].mxu0 %vm488_vm1, %v1891_v36  ;;  %1774 = vmatmul.mubr.msk.bf16.gmra.mrb[44].mxu1 %vm488_vm1, %v1891_v36 }
  0x7f   : > { %832 = vmatprep.mubr.bf16.mxu0 %v2036_v0  ;;  %943 = vmatprep.mubr.bf16.mxu1 %v2036_v0 }
  0x86   : > { %1766 = vmatmul.mubr.msk.bf16.gmra.mrb[48].mxu0 %vm488_vm1, %v1892_v40  ;;  %1775 = vmatmul.mubr.msk.bf16.gmra.mrb[48].mxu1 %vm488_vm1, %v1892_v40 }
  0x87   : > { %842 = vmatprep.mubr.bf16.mxu0 %v2036_v0  ;;  %953 = vmatprep.mubr.bf16.mxu1 %v2036_v0 }
  0x8e   : > { %1767 = vmatmul.mubr.msk.bf16.gmra.mrb[52].mxu0 %vm488_vm1, %v1893_v41  ;;  %1776 = vmatmul.mubr.msk.bf16.gmra.mrb[52].mxu1 %vm488_vm1, %v1893_v41 }
  0x8f   : > { %852 = vmatprep.mubr.bf16.mxu0 %v2036_v0  ;;  %963 = vmatprep.mubr.bf16.mxu1 %v2036_v0 }
  0x94   : > { %v2300_v44 = vpop.permute.xlu0 %375  ;;  %v2302_v45 = vpop.permute.xlu1 %385 }
  0x96   : > { %1768 = vmatmul.mubr.msk.bf16.gmra.mrb[56].mxu0 %vm488_vm1, %v1894_v42  ;;  %1777 = vmatmul.mubr.msk.bf16.gmra.mrb[56].mxu1 %vm488_vm1, %v1894_v42 }
  0x97   : > { %862 = vmatprep.mubr.bf16.mxu0 %v2036_v0  ;;  %973 = vmatprep.mubr.bf16.mxu1 %v2036_v0  ;;  %v1225_v0 = vunpack.c.l.s4 %v2037_v63 }
  0x98   : > { %v2304_v46 = vpop.permute.xlu0 %380  ;;  %v2306_v47 = vpop.permute.xlu1 %390 }
  0x99   : > { %v1226_v4 = vunpack.c.0.s8 %v1225_v0 }
  0x9b   : > { %v2338_v18 = vsub.s32 %v1226_v4, %v1228_v5 }
  0x9c   : > { %v2308_v48 = vpop.permute.xlu0 %395  ;;  %v2310_v49 = vpop.permute.xlu1 %400 }
  0x9e   : > { %1769 = vmatmul.mubr.msk.bf16.gmra.mrb[60].mxu0 %vm488_vm1, %v1895_v43  ;;  %1778 = vmatmul.mubr.msk.bf16.gmra.mrb[60].mxu1 %vm488_vm1, %v1895_v43 }
  0xa0   : > { %v2312_v50 = vpop.permute.xlu0 %405  ;;  %v2314_v51 = vpop.permute.xlu1 %410 }
  0xa4   : > { %v2316_v52 = vpop.permute.xlu0 %360  ;;  %v2318_v53 = vpop.permute.xlu1 %365 }
  0xa8   : > { %v2320_v54 = vpop.permute.xlu0 %415  ;;  %v2322_v55 = vpop.permute.xlu1 %370 }
  0xac   : > { %v2324_v3 = vpop.permute.xlu0 %345  ;;  %v2326_v6 = vpop.permute.xlu1 %350 }
  0xb0   : > { %v2341_v20 = vpop.permute.xlu0 %355 }
  0xf9   : > { %v572_v56 = vpop.f32.mrb[0].mxu0  ;;  %v683_v57 = vpop.f32.mrb[0].mxu1 }
  0xfa   : > { %v574_v58 = vpop.f32.mrb[1].mxu0  ;;  %v685_v59 = vpop.f32.mrb[1].mxu1  ;;  %v573_v14 = vadd.f32 %v572_v56, %v2324_v3  ;;  %v684_v21 = vadd.f32 %v683_v57, %v2324_v3 }
  0xfb   : > { %v576_v60 = vpop.f32.mrb[2].mxu0  ;;  %v687_v61 = vpop.f32.mrb[2].mxu1  ;;  %v575_v13 = vadd.f32 %v574_v58, %v2324_v3  ;;  %v686_v19 = vadd.f32 %v685_v59, %v2324_v3 }
  0xfc   : > { %v578_v62 = vpop.f32.mrb[3].mxu0  ;;  %v689_v2 = vpop.f32.mrb[3].mxu1  ;;  %v577_v25 = vadd.f32 %v576_v60, %v2326_v6  ;;  %v688_v26 = vadd.f32 %v687_v61, %v2326_v6 }
  0xfd   : > { %v579_v29 = vadd.f32 %v578_v62, %v2326_v6  ;;  %v690_v30 = vadd.f32 %v689_v2, %v2326_v6 }
 0x101   : > { %v582_v7 = vpop.f32.mrb[4].mxu0  ;;  %v693_v8 = vpop.f32.mrb[4].mxu1 }
 0x102   : > { %v584_v9 = vpop.f32.mrb[5].mxu0  ;;  %v2328_v10 = vpop.f32.mrb[5].mxu1  ;;  %v583_v36 = vadd.f32 %v582_v7, %v2341_v20  ;;  %v694_v41 = vadd.f32 %v693_v8, %v2341_v20 }
 0x103   : > { %v586_v11 = vpop.f32.mrb[6].mxu0  ;;  %v697_v16 = vpop.f32.mrb[6].mxu1  ;;  %v2356_v33 = vadd.f32 %v584_v9, %v2341_v20 }
 0x104   : > { %v587_v15 = vadd.f32 %v586_v11, %v2316_v52  ;;  %v588_v17 = vpop.f32.mrb[7].mxu0  ;;  %v698_v22 = vadd.f32 %v697_v16, %v2316_v52  ;;  %v699_v24 = vpop.f32.mrb[7].mxu1 }
 0x105   : > { %v589_v23 = vadd.f32 %v588_v17, %v2316_v52  ;;  %v700_v28 = vadd.f32 %v699_v24, %v2316_v52 }
 0x106   : > { %v984_v27 = vmul.f32 %v2330_v12, %v587_v15  ;;  %v986_v31 = vmul.f32 %v2330_v12, %v698_v22  ;;  %v1124_v37 = vmul.f32 %v587_v15, %v587_v15  ;;  %v1126_v42 = vmul.f32 %v698_v22, %v698_v22 }
 0x107   : > { %v985_v32 = vmul.f32 %v2330_v12, %v589_v23  ;;  %v987_v35 = vmul.f32 %v2330_v12, %v700_v28  ;;  %v1125_v43 = vmul.f32 %v589_v23, %v589_v23  ;;  %v1127_v61 = vmul.f32 %v700_v28, %v700_v28 }
 0x108   : > { %v1008_v34 = vadd.f32 %v984_v27, %v573_v14  ;;  %v1010_v38 = vadd.f32 %v986_v31, %v684_v21 }
 0x109   : > { %v1009_v39 = vadd.f32 %v985_v32, %v575_v13  ;;  %v592_v40 = vpop.f32.mrb[8].mxu0  ;;  %v1011_v56 = vadd.f32 %v987_v35, %v686_v19  ;;  %v703_v58 = vpop.f32.mrb[8].mxu1 }
 0x10a   : > { %v593_v57 = vadd.f32 %v592_v40, %v2318_v53  ;;  %v594_v59 = vpop.f32.mrb[9].mxu0  ;;  %v704_v62 = vadd.f32 %v703_v58, %v2318_v53  ;;  %v705_v0 = vpop.f32.mrb[9].mxu1 }
 0x10b   : > { %v1801_v60 = vpack.c.bf16 %v1009_v39, %v1008_v34  ;;  %v595_v63 = vadd.f32 %v594_v59, %v2318_v53  ;;  %v596_v1 = vpop.f32.mrb[10].mxu0  ;;  %v1802_v2 = vpack.c.bf16 %v1011_v56, %v1010_v38  ;;  %v706_v7 = vadd.f32 %v705_v0, %v2318_v53  ;;  %v707_v8 = vpop.f32.mrb[10].mxu1 }
 0x10c   : > { %v992_v4 = vmul.f32 %v2330_v12, %v593_v57  ;;  %v1132_v5 = vmul.f32 %v593_v57, %v593_v57  ;;  %v598_v9 = vpop.f32.mrb[11].mxu0  ;;  %v994_v11 = vmul.f32 %v2330_v12, %v704_v62  ;;  %v1134_v13 = vmul.f32 %v704_v62, %v704_v62  ;;  %v709_v16 = vpop.f32.mrb[11].mxu1 }
 0x10d   : > { %v993_v14 = vmul.f32 %v2330_v12, %v595_v63  ;;  %v1133_v15 = vmul.f32 %v595_v63, %v595_v63  ;;  %1112 = vst [vmem:[%s2370_s14] sm:$0xff] %v1801_v60  ;;  %v995_v21 = vmul.f32 %v2330_v12, %v706_v7  ;;  %v1135_v22 = vmul.f32 %v706_v7, %v706_v7 }
 0x10e   : > { %v1016_v17 = vadd.f32 %v992_v4, %v577_v25  ;;  %v1148_v19 = vadd.f32 %v1132_v5, %v1124_v37  ;;  %1113 = vst [vmem:[%s2370_s14 + $0x8] sm:$0xff] %v1802_v2  ;;  %v1018_v23 = vadd.f32 %v994_v11, %v688_v26  ;;  %v1164_v24 = vadd.f32 %v1134_v13, %v1126_v42 }
 0x10f   : > { %v1017_v27 = vadd.f32 %v993_v14, %v579_v29  ;;  %v1156_v28 = vadd.f32 %v1133_v15, %v1125_v43  ;;  %v1019_v31 = vadd.f32 %v995_v21, %v690_v30  ;;  %v1172_v32 = vadd.f32 %v1135_v22, %v1127_v61 }
 0x110   : > { %v597_v34 = vadd.f32 %v596_v1, %v2322_v55  ;;  %v708_v35 = vadd.f32 %v707_v8, %v2322_v55  ;;  %v696_v38 = vadd.f32 %v2328_v10, %v2341_v20  ;;  %v599_v25 = vadd.f32 %v598_v9, %v2322_v55 }
 0x111   : > { %v1805_v39 = vpack.c.bf16 %v1017_v27, %v1016_v17  ;;  %v710_v37 = vadd.f32 %v709_v16, %v2322_v55  ;;  %v602_v40 = vpop.f32.mrb[12].mxu0  ;;  %v1806_v26 = vpack.c.bf16 %v1019_v31, %v1018_v23  ;;  %v713_v43 = vpop.f32.mrb[12].mxu1 }
 0x112   : > { %v1000_v29 = vmul.f32 %v2330_v12, %v597_v34  ;;  %v1140_v42 = vmul.f32 %v597_v34, %v597_v34  ;;  %v1002_v30 = vmul.f32 %v2330_v12, %v708_v35  ;;  %v604_v56 = vpop.f32.mrb[13].mxu0  ;;  %v1142_v57 = vmul.f32 %v708_v35, %v708_v35  ;;  %v715_v60 = vpop.f32.mrb[13].mxu1 }
 0x113   : > { %v1001_v58 = vmul.f32 %v2330_v12, %v599_v25  ;;  %v1141_v10 = vmul.f32 %v599_v25, %v599_v25  ;;  %v1003_v59 = vmul.f32 %v2330_v12, %v710_v37  ;;  %v606_v61 = vpop.f32.mrb[14].mxu0  ;;  %1116 = vst [vmem:[%s2370_s14 + $0x20] sm:$0xff] %v1805_v39  ;;  %v1143_v1 = vmul.f32 %v710_v37, %v710_v37  ;;  %v717_v2 = vpop.f32.mrb[14].mxu1 }
 0x114   : > { %v1024_v62 = vadd.f32 %v1000_v29, %v583_v36  ;;  %v1149_v63 = vadd.f32 %v1148_v19, %v1140_v42  ;;  %v1026_v0 = vadd.f32 %v1002_v30, %v694_v41  ;;  %v608_v4 = vpop.f32.mrb[15].mxu0  ;;  %1117 = vst [vmem:[%s2370_s14 + $0x28] sm:$0xff] %v1806_v26  ;;  %v1165_v5 = vadd.f32 %v1164_v24, %v1142_v57  ;;  %v719_v11 = vpop.f32.mrb[15].mxu1 }
 0x115   : > { %v1025_v7 = vadd.f32 %v1001_v58, %v2356_v33  ;;  %v1157_v8 = vadd.f32 %v1156_v28, %v1141_v10  ;;  %v1027_v9 = vadd.f32 %v1003_v59, %v696_v38  ;;  %v1173_v14 = vadd.f32 %v1172_v32, %v1143_v1 }
 0x116   : > { %v1150_v13 = vrot.slane %v1149_v63, 4  ;;  %v603_v15 = vadd.f32 %v602_v40, %v2300_v44  ;;  %v714_v36 = vadd.f32 %v713_v43, %v2300_v44  ;;  %v1166_v16 = vrot.slane %v1165_v5, 4 }
 0x117   : > { %v1809_v41 = vpack.c.bf16 %v1025_v7, %v1024_v62  ;;  %v1158_v17 = vrot.slane %v1157_v8, 4  ;;  %v1810_v19 = vpack.c.bf16 %v1027_v9, %v1026_v0  ;;  %v1174_v22 = vrot.slane %v1173_v14, 4 }
 0x118   : > { %v1151_v21 = vadd.f32 %v1150_v13, %v1149_v63  ;;  %v1271_v23 = vmul.f32 %v603_v15, %v603_v15  ;;  %v1273_v24 = vmul.f32 %v714_v36, %v714_v36  ;;  %v1167_v33 = vadd.f32 %v1166_v16, %v1165_v5 }
 0x119   : > { %v1159_v27 = vadd.f32 %v1158_v17, %v1157_v8  ;;  %v605_v28 = vadd.f32 %v604_v56, %v2300_v44  ;;  %v716_v31 = vadd.f32 %v715_v60, %v2300_v44  ;;  %v612_v32 = vpop.f32.mrb[16].mxu0  ;;  %1120 = vst [vmem:[%s2370_s14 + $0x40] sm:$0xff] %v1809_v41  ;;  %1121 = vst [vmem:[%s2370_s14 + $0x48] sm:$0xff] %v1810_v19  ;;  %v723_v25 = vpop.f32.mrb[16].mxu1 }
 0x11a   : > { %v1152_v34 = vrot.slane %v1151_v21, 2  ;;  %v1175_v35 = vadd.f32 %v1174_v22, %v1173_v14  ;;  %v607_v38 = vadd.f32 %v606_v61, %v2304_v46  ;;  %v718_v39 = vadd.f32 %v717_v2, %v2304_v46  ;;  %v614_v37 = vpop.f32.mrb[17].mxu0  ;;  %v725_v30 = vpop.f32.mrb[17].mxu1 }
 0x11b   : > { %v1168_v40 = vrot.slane %v1167_v33, 2  ;;  %v1160_v26 = vrot.slane %v1159_v27, 2  ;;  %v1272_v29 = vmul.f32 %v605_v28, %v605_v28  ;;  %v1274_v42 = vmul.f32 %v716_v31, %v716_v31  ;;  %v616_v43 = vpop.f32.mrb[18].mxu0  ;;  %v727_v59 = vpop.f32.mrb[18].mxu1 }
 0x11c   : > { %v1153_v56 = vadd.f32 %v1152_v34, %v1151_v21  ;;  %v1176_v57 = vrot.slane %v1175_v35, 2  ;;  %v1279_v58 = vmul.f32 %v607_v38, %v607_v38  ;;  %v1281_v10 = vmul.f32 %v718_v39, %v718_v39  ;;  %v618_v60 = vpop.f32.mrb[19].mxu0  ;;  %v729_v1 = vpop.f32.mrb[19].mxu1 }
 0x11d   : > { %v1169_v62 = vadd.f32 %v1168_v40, %v1167_v33  ;;  %v1161_v63 = vadd.f32 %v1160_v26, %v1159_v27  ;;  %v609_v61 = vadd.f32 %v608_v4, %v2304_v46  ;;  %v720_v0 = vadd.f32 %v719_v11, %v2304_v46 }
 0x11e   : > { %v1154_v2 = vrot.slane %v1153_v56, 1  ;;  %v1177_v5 = vadd.f32 %v1176_v57, %v1175_v35  ;;  %v1343_v7 = vadd.f32 %v1279_v58, %v1271_v23  ;;  %v1371_v8 = vadd.f32 %v1281_v10, %v1273_v24 }
 0x11f   : > { %v1170_v9 = vrot.slane %v1169_v62, 1  ;;  %v1162_v13 = vrot.slane %v1161_v63, 1  ;;  %v1280_v14 = vmul.f32 %v609_v61, %v609_v61  ;;  %v1282_v15 = vmul.f32 %v720_v0, %v720_v0 }
 0x120   : > { %v2398_v36 = vadd.f32 %v1154_v2, %v1153_v56  ;;  %v1178_v16 = vrot.slane %v1177_v5, 1  ;;  %v613_v41 = vadd.f32 %v612_v32, %v2302_v45  ;;  %v724_v17 = vadd.f32 %v723_v25, %v2302_v45 }
 0x121   : > { %v2402_v19 = vadd.f32 %v1170_v9, %v1169_v62  ;;  %v2404_v4 = vadd.f32 %v1162_v13, %v1161_v63  ;;  %v1357_v11 = vadd.f32 %v1280_v14, %v1272_v29  ;;  %v1385_v21 = vadd.f32 %v1282_v15, %v1274_v42  ;;  %v622_v22 = vpop.f32.mrb[20].mxu0  ;;  %v733_v28 = vpop.f32.mrb[20].mxu1 }
 0x122   : > { %v2406_v23 = vadd.f32 %v1178_v16, %v1177_v5  ;;  %v1287_v24 = vmul.f32 %v613_v41, %v613_v41  ;;  %v1289_v33 = vmul.f32 %v724_v17, %v724_v17  ;;  %v615_v27 = vadd.f32 %v614_v37, %v2302_v45  ;;  %v624_v31 = vpop.f32.mrb[21].mxu0  ;;  %v735_v39 = vpop.f32.mrb[21].mxu1 }
 0x123   : > { %v1220_v32 = vcombine.low %v2398_v36, %v2404_v4  ;;  %v726_v34 = vadd.f32 %v725_v30, %v2302_v45  ;;  %v617_v35 = vadd.f32 %v616_v43, %v2306_v47  ;;  %v728_v38 = vadd.f32 %v727_v59, %v2306_v47  ;;  %v626_v25 = vpop.f32.mrb[22].mxu0  ;;  %v737_v37 = vpop.f32.mrb[22].mxu1 }
 0x124   : > { %v1221_v40 = vcombine.low %v2402_v19, %v2406_v23  ;;  %v1344_v26 = vadd.f32 %v1343_v7, %v1287_v24  ;;  %v1372_v29 = vadd.f32 %v1371_v8, %v1289_v33  ;;  %v1288_v42 = vmul.f32 %v615_v27, %v615_v27  ;;  %v628_v56 = vpop.f32.mrb[23].mxu0  ;;  %v739_v30 = vpop.f32.mrb[23].mxu1 }
 0x125   : > { %v1290_v57 = vmul.f32 %v726_v34, %v726_v34  ;;  %v1295_v58 = vmul.f32 %v617_v35, %v617_v35  ;;  %v1297_v10 = vmul.f32 %v728_v38, %v728_v38  ;;  %v619_v62 = vadd.f32 %v618_v60, %v2306_v47 }
 0x126   : > { %v1358_v63 = vadd.f32 %v1357_v11, %v1288_v42  ;;  %v730_v43 = vadd.f32 %v729_v1, %v2306_v47  ;;  %v623_v59 = vadd.f32 %v622_v22, %v2308_v48  ;;  %v734_v61 = vadd.f32 %v733_v28, %v2308_v48 }
 0x127   : > { %v1386_v0 = vadd.f32 %v1385_v21, %v1290_v57  ;;  %v1345_v2 = vadd.f32 %v1344_v26, %v1295_v58  ;;  %v1373_v5 = vadd.f32 %v1372_v29, %v1297_v10  ;;  %v1296_v7 = vmul.f32 %v619_v62, %v619_v62 }
 0x128   : > { %v1298_v8 = vmul.f32 %v730_v43, %v730_v43  ;;  %v1303_v9 = vmul.f32 %v623_v59, %v623_v59  ;;  %v1305_v13 = vmul.f32 %v734_v61, %v734_v61  ;;  %v625_v14 = vadd.f32 %v624_v31, %v2308_v48 }
 0x129   : > { %v1359_v15 = vadd.f32 %v1358_v63, %v1296_v7  ;;  %v736_v60 = vadd.f32 %v735_v39, %v2308_v48  ;;  %v627_v16 = vadd.f32 %v626_v25, %v2310_v49  ;;  %v738_v1 = vadd.f32 %v737_v37, %v2310_v49  ;;  %v632_v41 = vpop.f32.mrb[24].mxu0  ;;  %v743_v24 = vpop.f32.mrb[24].mxu1 }
 0x12a   : > { %v1387_v17 = vadd.f32 %v1386_v0, %v1298_v8  ;;  %v1346_v11 = vadd.f32 %v1345_v2, %v1303_v9  ;;  %v1374_v22 = vadd.f32 %v1373_v5, %v1305_v13  ;;  %v1304_v21 = vmul.f32 %v625_v14, %v625_v14  ;;  %v634_v33 = vpop.f32.mrb[25].mxu0  ;;  %v745_v31 = vpop.f32.mrb[25].mxu1 }
 0x12b   : > { %v1306_v27 = vmul.f32 %v736_v60, %v736_v60  ;;  %v1311_v28 = vmul.f32 %v627_v16, %v627_v16  ;;  %v1313_v34 = vmul.f32 %v738_v1, %v738_v1  ;;  %v629_v35 = vadd.f32 %v628_v56, %v2310_v49  ;;  %v636_v38 = vpop.f32.mrb[26].mxu0  ;;  %v747_v42 = vpop.f32.mrb[26].mxu1 }
 0x12c   : > { %v1360_v26 = vadd.f32 %v1359_v15, %v1304_v21  ;;  %v740_v39 = vadd.f32 %v739_v30, %v2310_v49  ;;  %v633_v25 = vadd.f32 %v632_v41, %v2312_v50  ;;  %v744_v29 = vadd.f32 %v743_v24, %v2312_v50  ;;  %v638_v37 = vpop.f32.mrb[27].mxu0  ;;  %v749_v63 = vpop.f32.mrb[27].mxu1 }
 0x12d   : > { %v1388_v57 = vadd.f32 %v1387_v17, %v1306_v27  ;;  %v1347_v58 = vadd.f32 %v1346_v11, %v1311_v28  ;;  %v1375_v10 = vadd.f32 %v1374_v22, %v1313_v34  ;;  %v1312_v62 = vmul.f32 %v629_v35, %v629_v35 }
 0x12e   : > { %v1314_v43 = vmul.f32 %v740_v39, %v740_v39  ;;  %v1319_v59 = vmul.f32 %v633_v25, %v633_v25  ;;  %v1321_v61 = vmul.f32 %v744_v29, %v744_v29  ;;  %v635_v56 = vadd.f32 %v634_v33, %v2312_v50 }
 0x12f   : > { %v1361_v0 = vadd.f32 %v1360_v26, %v1312_v62  ;;  %v746_v2 = vadd.f32 %v745_v31, %v2312_v50  ;;  %v637_v30 = vadd.f32 %v636_v38, %v2314_v51  ;;  %v748_v5 = vadd.f32 %v747_v42, %v2314_v51 }
 0x130   : > { %v1389_v7 = vadd.f32 %v1388_v57, %v1314_v43  ;;  %v1348_v8 = vadd.f32 %v1347_v58, %v1319_v59  ;;  %v1376_v9 = vadd.f32 %v1375_v10, %v1321_v61  ;;  %v1320_v13 = vmul.f32 %v635_v56, %v635_v56 }
 0x131   : > { %v1322_v14 = vmul.f32 %v746_v2, %v746_v2  ;;  %v1327_v15 = vmul.f32 %v637_v30, %v637_v30  ;;  %v1329_v60 = vmul.f32 %v748_v5, %v748_v5  ;;  %v639_v16 = vadd.f32 %v638_v37, %v2314_v51  ;;  %v642_v1 = vpop.f32.mrb[28].mxu0  ;;  %v753_v22 = vpop.f32.mrb[28].mxu1 }
 0x132   : > { %v1362_v41 = vadd.f32 %v1361_v0, %v1320_v13  ;;  %v750_v17 = vadd.f32 %v749_v63, %v2314_v51  ;;  %v643_v11 = vadd.f32 %v642_v1, %v2320_v54  ;;  %v644_v21 = vpop.f32.mrb[29].mxu0  ;;  %v2439_v24 = vrot.slane %v1220_v32, %v2338_v18  ;;  %v755_v35 = vpop.f32.mrb[29].mxu1 }
 0x133   : > { %v1390_v33 = vadd.f32 %v1389_v7, %v1322_v14  ;;  %v1349_v27 = vadd.f32 %v1348_v8, %v1327_v15  ;;  %v1377_v28 = vadd.f32 %v1376_v9, %v1329_v60  ;;  %v1328_v34 = vmul.f32 %v639_v16, %v639_v16  ;;  %v646_v31 = vpop.f32.mrb[30].mxu0  ;;  %v757_v29 = vpop.f32.mrb[30].mxu1 }
 0x134   : > { %v1330_v38 = vmul.f32 %v750_v17, %v750_v17  ;;  %v1335_v26 = vmul.f32 %v643_v11, %v643_v11  ;;  %v754_v39 = vadd.f32 %v753_v22, %v2320_v54  ;;  %v645_v25 = vadd.f32 %v644_v21, %v2320_v54  ;;  %v647_v42 = vpop.f32.mrb[31].mxu0  ;;  %v758_v36 = vpop.f32.mrb[31].mxu1 }
 0x135   : > { %v1363_v37 = vadd.f32 %v1362_v41, %v1328_v34  ;;  %v756_v57 = vadd.f32 %v755_v35, %v2320_v54  ;;  %v2448_v4 = vrot.slane %v1221_v40, %v2338_v18 }
 0x136   : > { %v1391_v32 = vadd.f32 %v1390_v33, %v1330_v38  ;;  %v1350_v58 = vadd.f32 %v1349_v27, %v1335_v26  ;;  %v1337_v10 = vmul.f32 %v754_v39, %v754_v39  ;;  %v1336_v62 = vmul.f32 %v645_v25, %v645_v25 }
 0x137   : > { %v1338_v63 = vmul.f32 %v756_v57, %v756_v57  ;;  %v1252_v43 = vcombine.low %v2439_v24, %v2448_v4 }
 0x138   : > { %v1351_v59 = vrot.slane %v1350_v58, 4  ;;  %v1378_v61 = vadd.f32 %v1377_v28, %v1337_v10  ;;  %v1364_v56 = vadd.f32 %v1363_v37, %v1336_v62 }
 0x139   : > { %v1392_v0 = vadd.f32 %v1391_v32, %v1338_v63  ;;  %v794_v2 = vpop.f32.mrb[32].mxu0  ;;  %v905_v8 = vpop.f32.mrb[32].mxu1 }
 0x13a   : > { %v1352_v30 = vadd.f32 %v1351_v59, %v1350_v58  ;;  %v1379_v5 = vrot.slane %v1378_v61, 4  ;;  %v1365_v7 = vrot.slane %v1364_v56, 4  ;;  %v796_v19 = vpop.f32.mrb[33].mxu0  ;;  %v907_v40 = vpop.f32.mrb[33].mxu1  ;;  %v795_v34 = vadd.f32 %v794_v2, %v2324_v3 }
 0x13b   : > { %v1393_v23 = vrot.slane %v1392_v0, 4  ;;  %v798_v9 = vpop.f32.mrb[34].mxu0  ;;  %v909_v60 = vpop.f32.mrb[34].mxu1  ;;  %v906_v31 = vadd.f32 %v905_v8, %v2324_v3  ;;  %v797_v38 = vadd.f32 %v796_v19, %v2324_v3  ;;  %v908_v26 = vadd.f32 %v907_v40, %v2324_v3 }
 0x13c   : > { %v1353_v13 = vrot.slane %v1352_v30, 2  ;;  %v1380_v14 = vadd.f32 %v1379_v5, %v1378_v61  ;;  %v1366_v15 = vadd.f32 %v1365_v7, %v1364_v56  ;;  %v800_v16 = vpop.f32.mrb[35].mxu0  ;;  %v911_v41 = vpop.f32.mrb[35].mxu1  ;;  %v799_v58 = vadd.f32 %v798_v9, %v2326_v6 }
 0x13d   : > { %v1394_v1 = vadd.f32 %v1393_v23, %v1392_v0  ;;  %v910_v7 = vadd.f32 %v909_v60, %v2326_v6  ;;  %v801_v9 = vadd.f32 %v800_v16, %v2326_v6 }
 0x13e   : > { %v1354_v17 = vadd.f32 %v1353_v13, %v1352_v30  ;;  %v1381_v11 = vrot.slane %v1380_v14, 2  ;;  %v1367_v22 = vrot.slane %v1366_v15, 2 }
 0x13f   : > { %v1395_v21 = vrot.slane %v1394_v1, 2 }
 0x140   : > { %v1355_v33 = vrot.slane %v1354_v17, 1  ;;  %v1382_v27 = vadd.f32 %v1381_v11, %v1380_v14  ;;  %v1368_v28 = vadd.f32 %v1367_v22, %v1366_v15  ;;  %v912_v15 = vadd.f32 %v911_v41, %v2326_v6 }
 0x141   : > { %v1396_v35 = vadd.f32 %v1395_v21, %v1394_v1  ;;  %v804_v39 = vpop.f32.mrb[36].mxu0  ;;  %v915_v57 = vpop.f32.mrb[36].mxu1 }
 0x142   : > { %v1356_v25 = vadd.f32 %v1355_v33, %v1354_v17  ;;  %v1383_v29 = vrot.slane %v1382_v27, 1  ;;  %v1369_v42 = vrot.slane %v1368_v28, 1  ;;  %v2457_v37 = vadd.f32 %v804_v39, %v2341_v20  ;;  %v806_v36 = vpop.f32.mrb[37].mxu0  ;;  %v917_v63 = vpop.f32.mrb[37].mxu1 }
 0x143   : > { %v1397_v32 = vrot.slane %v1396_v35, 1  ;;  %v2461_v10 = vadd.f32 %v915_v57, %v2341_v20  ;;  %v2464_v62 = vadd.f32 %v806_v36, %v2341_v20  ;;  %v808_v3 = vpop.f32.mrb[38].mxu0  ;;  %v2467_v56 = vadd.f32 %v917_v63, %v2341_v20  ;;  %v919_v2 = vpop.f32.mrb[38].mxu1 }
 0x144   : > { %v1384_v59 = vadd.f32 %v1383_v29, %v1382_v27  ;;  %v1370_v61 = vadd.f32 %v1369_v42, %v1368_v28  ;;  %v809_v0 = vadd.f32 %v808_v3, %v2316_v52  ;;  %v810_v30 = vpop.f32.mrb[39].mxu0  ;;  %v920_v8 = vadd.f32 %v919_v2, %v2316_v52  ;;  %v921_v23 = vpop.f32.mrb[39].mxu1 }
 0x145   : > { %v1398_v5 = vadd.f32 %v1397_v32, %v1396_v35  ;;  %v811_v19 = vadd.f32 %v810_v30, %v2316_v52  ;;  %v922_v20 = vadd.f32 %v921_v23, %v2316_v52 }
 0x146   : > { %v1463_v40 = vcombine.low %v1356_v25, %v1370_v61  ;;  %v988_v13 = vmul.f32 %v2330_v12, %v809_v0  ;;  %v990_v1 = vmul.f32 %v2330_v12, %v920_v8  ;;  %v1128_v11 = vmul.f32 %v809_v0, %v809_v0 }
 0x147   : > { %v1464_v14 = vcombine.low %v1384_v59, %v1398_v5  ;;  %v989_v17 = vmul.f32 %v2330_v12, %v811_v19  ;;  %v1130_v22 = vmul.f32 %v920_v8, %v920_v8  ;;  %v991_v21 = vmul.f32 %v2330_v12, %v922_v20 }
 0x148   : > { %v1012_v60 = vadd.f32 %v988_v13, %v795_v34  ;;  %v1014_v33 = vadd.f32 %v990_v1, %v906_v31  ;;  %v2481_v16 = vrot.slane %v1463_v40, %v2338_v18  ;;  %v1129_v35 = vmul.f32 %v811_v19, %v811_v19 }
 0x149   : > { %v1013_v27 = vadd.f32 %v989_v17, %v797_v38  ;;  %v814_v28 = vpop.f32.mrb[40].mxu0  ;;  %v2484_v52 = vrot.slane %v1464_v14, %v2338_v18  ;;  %v1015_v6 = vadd.f32 %v991_v21, %v908_v26  ;;  %v1131_v41 = vmul.f32 %v922_v20, %v922_v20  ;;  %v925_v25 = vpop.f32.mrb[40].mxu1 }
 0x14a   : > { %v815_v39 = vadd.f32 %v814_v28, %v2318_v53  ;;  %v816_v34 = vpop.f32.mrb[41].mxu0  ;;  %v926_v42 = vadd.f32 %v925_v25, %v2318_v53  ;;  %v927_v38 = vpop.f32.mrb[41].mxu1 }
 0x14b   : > { %v1803_v29 = vpack.c.bf16 %v1013_v27, %v1012_v60  ;;  %v817_v31 = vadd.f32 %v816_v34, %v2318_v53  ;;  %v818_v57 = vpop.f32.mrb[42].mxu0  ;;  %v1495_v36 = vcombine.low %v2481_v16, %v2484_v52  ;;  %v1804_v32 = vpack.c.bf16 %v1015_v6, %v1014_v33  ;;  %v929_v59 = vpop.f32.mrb[42].mxu1 }
 0x14c   : > { %v996_v26 = vmul.f32 %v2330_v12, %v815_v39  ;;  %v1136_v63 = vmul.f32 %v815_v39, %v815_v39  ;;  %v928_v3 = vadd.f32 %v927_v38, %v2318_v53  ;;  %v820_v61 = vpop.f32.mrb[43].mxu0  ;;  %v998_v0 = vmul.f32 %v2330_v12, %v926_v42  ;;  %v931_v8 = vpop.f32.mrb[43].mxu1 }
 0x14d   : > { %v1138_v2 = vmul.f32 %v926_v42, %v926_v42  ;;  %v997_v30 = vmul.f32 %v2330_v12, %v817_v31  ;;  %v1137_v5 = vmul.f32 %v817_v31, %v817_v31  ;;  %1114 = vst [vmem:[%s2370_s14 + $0x10] sm:$0xff] %v1803_v29  ;;  %1115 = vst [vmem:[%s2370_s14 + $0x18] sm:$0xff] %v1804_v32 }
 0x14e   : > { %v1020_v19 = vadd.f32 %v996_v26, %v799_v58  ;;  %v1180_v23 = vadd.f32 %v1136_v63, %v1128_v11  ;;  %v999_v40 = vmul.f32 %v2330_v12, %v928_v3  ;;  %v1139_v13 = vmul.f32 %v928_v3, %v928_v3 }
 0x14f   : > { %v1022_v20 = vadd.f32 %v998_v0, %v910_v7  ;;  %v1196_v14 = vadd.f32 %v1138_v2, %v1130_v22  ;;  %v1021_v1 = vadd.f32 %v997_v30, %v801_v9  ;;  %v1188_v53 = vadd.f32 %v1137_v5, %v1129_v35 }
 0x150   : > { %v1023_v17 = vadd.f32 %v999_v40, %v912_v15  ;;  %v1204_v60 = vadd.f32 %v1139_v13, %v1131_v41  ;;  %v819_v21 = vadd.f32 %v818_v57, %v2322_v55  ;;  %v930_v33 = vadd.f32 %v929_v59, %v2322_v55 }
 0x151   : > { %v1807_v27 = vpack.c.bf16 %v1021_v1, %v1020_v19  ;;  %v821_v28 = vadd.f32 %v820_v61, %v2322_v55  ;;  %v932_v58 = vadd.f32 %v931_v8, %v2322_v55  ;;  %v824_v11 = vpop.f32.mrb[44].mxu0  ;;  %v935_v22 = vpop.f32.mrb[44].mxu1 }
 0x152   : > { %v1808_v6 = vpack.c.bf16 %v1023_v17, %v1022_v20  ;;  %v1004_v7 = vmul.f32 %v2330_v12, %v819_v21  ;;  %v1144_v9 = vmul.f32 %v819_v21, %v819_v21  ;;  %v1006_v15 = vmul.f32 %v2330_v12, %v930_v33  ;;  %v826_v35 = vpop.f32.mrb[45].mxu0  ;;  %v937_v29 = vpop.f32.mrb[45].mxu1 }
 0x153   : > { %v1146_v41 = vmul.f32 %v930_v33, %v930_v33  ;;  %v1005_v39 = vmul.f32 %v2330_v12, %v821_v28  ;;  %v1145_v25 = vmul.f32 %v821_v28, %v821_v28  ;;  %v1007_v34 = vmul.f32 %v2330_v12, %v932_v58  ;;  %v828_v42 = vpop.f32.mrb[46].mxu0  ;;  %1118 = vst [vmem:[%s2370_s14 + $0x30] sm:$0xff] %v1807_v27  ;;  %v939_v32 = vpop.f32.mrb[46].mxu1 }
 0x154   : > { %v1028_v55 = vadd.f32 %v1004_v7, %v2457_v37  ;;  %v1181_v31 = vadd.f32 %v1180_v23, %v1144_v9  ;;  %v1030_v38 = vadd.f32 %v1006_v15, %v2461_v10  ;;  %v1147_v57 = vmul.f32 %v932_v58, %v932_v58  ;;  %v2511_v26 = vpop.f32.mrb[47].mxu0  ;;  %1119 = vst [vmem:[%s2370_s14 + $0x38] sm:$0xff] %v1808_v6  ;;  %v2516_v61 = vpop.f32.mrb[47].mxu1 }
 0x155   : > { %v1197_v63 = vadd.f32 %v1196_v14, %v1146_v41  ;;  %v1029_v3 = vadd.f32 %v1005_v39, %v2464_v62  ;;  %v1189_v59 = vadd.f32 %v1188_v53, %v1145_v25  ;;  %v1031_v12 = vadd.f32 %v1007_v34, %v2467_v56 }
 0x156   : > { %v1182_v0 = vrot.slane %v1181_v31, 4  ;;  %v1205_v2 = vadd.f32 %v1204_v60, %v1147_v57  ;;  %v825_v37 = vadd.f32 %v824_v11, %v2300_v44  ;;  %v936_v30 = vadd.f32 %v935_v22, %v2300_v44 }
 0x157   : > { %v1198_v10 = vrot.slane %v1197_v63, 4  ;;  %v1811_v5 = vpack.c.bf16 %v1029_v3, %v1028_v55  ;;  %v1190_v8 = vrot.slane %v1189_v59, 4  ;;  %v1812_v19 = vpack.c.bf16 %v1031_v12, %v1030_v38 }
 0x158   : > { %v1183_v62 = vadd.f32 %v1182_v0, %v1181_v31  ;;  %v1206_v56 = vrot.slane %v1205_v2, 4  ;;  %v2527_v23 = vmul.f32 %v825_v37, %v825_v37  ;;  %v2529_v40 = vmul.f32 %v936_v30, %v936_v30 }
 0x159   : > { %v1199_v13 = vadd.f32 %v1198_v10, %v1197_v63  ;;  %v1191_v20 = vadd.f32 %v1190_v8, %v1189_v59  ;;  %v827_v14 = vadd.f32 %v826_v35, %v2300_v44  ;;  %v938_v1 = vadd.f32 %v937_v29, %v2300_v44  ;;  %v2533_v53 = vpop.f32.mrb[48].mxu0  ;;  %1122 = vst [vmem:[%s2370_s14 + $0x50] sm:$0xff] %v1811_v5  ;;  %v945_v27 = vpop.f32.mrb[48].mxu1 }
 0x15a   : > { %1123 = vst [vmem:[%s2370_s14 + $0x58] sm:$0xff] %v1812_v19  ;;  %v1184_v17 = vrot.slane %v1183_v62, 2  ;;  %v1207_v60 = vadd.f32 %v1206_v56, %v1205_v2  ;;  %v829_v21 = vadd.f32 %v828_v42, %v2304_v46  ;;  %v940_v33 = vadd.f32 %v939_v32, %v2304_v46  ;;  %v2539_v28 = vpop.f32.mrb[49].mxu0 }
 0x15b   : > { %1909 = shalt.err (!%p1906_p5)
}
 0x15c   : > { %s1910_s13 = scalar_lea.hbm %s2525_s19, 1536  ;;  %s1914_s17 = scalar_lea.hbm %s2736_s4, 3072 }
 0x15d   : > { %p1911_p6 = scmp.ne.s32.totalorder %s2525_s19, %s1910_s13  ;;  %p1915_p10 = scmp.lt.u32.totalorder %s2525_s19, %s2736_s4 }
 0x15e   : > { %p1916_p11 = scmp.lt.u32.totalorder %s1914_s17, %s1910_s13  ;;  %p1918_p13 = scmp.lt.u32.totalorder %s1910_s13, %s2525_s19 }
 0x15f   : > { %p1912_p7 = pnand %p1911_p6, %p2123_p4 }
 0x160   : > { %p1917_p12 = por %p1916_p11, %p1915_p10 }
 0x161   : > { %p1913_p9 = pneg %p1912_p7 }
 0x162   : > { %p1919_p0 = por %p1918_p13, %p1917_p12 }
 0x164   : > { %p1920_p1 = pnand %p1919_p0, %p1913_p9 }
 0x166   : > { %1923 = shalt.err (!%p1920_p1)
}
 0x167   : > { %s2039_s21 = smov 512   ;;  %s2040_s7 = smov 32   ;;  %v1200_v44 = vrot.slane %v1199_v13, 2  ;;  %v1192_v58 = vrot.slane %v1191_v20, 2  ;;  %v1276_v11 = vmul.f32 %v827_v14, %v827_v14  ;;  %v1278_v6 = vmul.f32 %v938_v1, %v938_v1  ;;  %v947_v7 = vpop.f32.mrb[49].mxu1  ;;  %v838_v9 = vpop.f32.mrb[50].mxu0 }
 0x168   : > { %1817 = dma.vmem_to_hbm [thread:$0]  (%p2123_p4), %s2520_s15, 1536, %s2525_s19, %s1515_s20, %s2039_s21, %s2039_s21, %s2040_s7   ;;  %v1185_v15 = vadd.f32 %v1184_v17, %v1183_v62  ;;  %v1208_v22 = vrot.slane %v1207_v60, 2  ;;  %v1283_v35 = vmul.f32 %v829_v21, %v829_v21  ;;  %v1285_v41 = vmul.f32 %v940_v33, %v940_v33  ;;  %v949_v39 = vpop.f32.mrb[50].mxu1  ;;  %v840_v25 = vpop.f32.mrb[51].mxu0 }
 0x169   : > { %v1201_v34 = vadd.f32 %v1200_v44, %v1199_v13  ;;  %v1193_v29 = vadd.f32 %v1192_v58, %v1191_v20  ;;  %v831_v42 = vadd.f32 %v2511_v26, %v2304_v46  ;;  %v942_v55 = vadd.f32 %v2516_v61, %v2304_v46  ;;  %v951_v31 = vpop.f32.mrb[51].mxu1  ;;  %v844_v8 = vpop.f32.mrb[52].mxu0  ;;  %s1723_s15 = sshll.u32 %s2333_s12, 3  ;;  %s2636_s20 = sand.u32 1, %s1718_s3  }
 0x16a   : > { %v1186_v38 = vrot.slane %v1185_v15, 1  ;;  %v1209_v57 = vadd.f32 %v1208_v22, %v1207_v60  ;;  %v1399_v32 = vadd.f32 %v1283_v35, %v2527_v23  ;;  %v1427_v63 = vadd.f32 %v1285_v41, %v2529_v40  ;;  %v955_v40 = vpop.f32.mrb[52].mxu1  ;;  %v846_v13 = vpop.f32.mrb[53].mxu0  ;;  %s2629_s19 = scalar_lea.vmem [#allocation7], %s1723_s15  ;;  %s1813_s9 = sshll.u32 %s2026_s26, 7 }
 0x16b   : > { %v1202_v3 = vrot.slane %v1201_v34, 1  ;;  %v1194_v59 = vrot.slane %v1193_v29, 1  ;;  %v1284_v12 = vmul.f32 %v831_v42, %v831_v42  ;;  %v1286_v0 = vmul.f32 %v942_v55, %v942_v55  ;;  %v957_v17 = vpop.f32.mrb[53].mxu1  ;;  %v848_v60 = vpop.f32.mrb[54].mxu0  ;;  %s285_s13 = scalar_lea.vmem [#allocation5], %s1723_s15  ;;  %s1575_s16 = sshll.u32 %s2629_s19, 4  ;;  %s2659_s16 = int_to_ptr.vmem [resolvable:$true] %s1575_s16 }
 0x16c   : > { %v2571_v2 = vadd.f32 %v1186_v38, %v1185_v15  ;;  %v1210_v37 = vrot.slane %v1209_v57, 1  ;;  %v835_v26 = vadd.f32 %v2533_v53, %v2302_v45  ;;  %v946_v30 = vadd.f32 %v945_v27, %v2302_v45  ;;  %v850_v58 = vpop.f32.mrb[55].mxu0  ;;  %s1559_s14 = sshll.u32 %s285_s13, 4  ;;  %s2650_s3 = scalar_lea.hbm %s2737_s5, %s1813_s9  ;;  %s2652_s14 = int_to_ptr.vmem [resolvable:$true] %s1559_s14 }
 0x16d   : > { %v2576_v46 = vadd.f32 %v1202_v3, %v1201_v34  ;;  %v2578_v61 = vadd.f32 %v1194_v59, %v1193_v29  ;;  %v1413_v10 = vadd.f32 %v1284_v12, %v1276_v11  ;;  %v1441_v5 = vadd.f32 %v1286_v0, %v1278_v6  ;;  %s2657_s22 = scalar_lea.hbm %s2738_s6, %s1813_s9  ;;  %s1520_s21 = scalar_lea.sflag [#allocation6], %s2636_s20 }
 0x16e   : > { %v2580_v19 = vadd.f32 %v1210_v37, %v1209_v57  ;;  %v1291_v62 = vmul.f32 %v835_v26, %v835_v26  ;;  %v1293_v56 = vmul.f32 %v946_v30, %v946_v30  ;;  %v837_v23 = vadd.f32 %v2539_v28, %v2302_v45  ;;  %v959_v28 = vpop.f32.mrb[54].mxu1  ;;  %s1924_s7 = scalar_lea.vmem %s2652_s14, 128  ;;  %s2041_s15 = smov [#allocation5]  }
 0x16f   : > { %v1222_v20 = vcombine.low %v2571_v2, %v2578_v61  ;;  %v948_v14 = vadd.f32 %v947_v7, %v2302_v45  ;;  %v839_v1 = vadd.f32 %v838_v9, %v2306_v47  ;;  %v950_v53 = vadd.f32 %v949_v39, %v2306_v47  ;;  %v961_v45 = vpop.f32.mrb[55].mxu1  ;;  %p1925_p2 = scmp.ne.s32.totalorder %s2652_s14, %s1924_s7 }
 0x170   : > { %v1223_v21 = vcombine.low %v2576_v46, %v2580_v19  ;;  %v1400_v33 = vadd.f32 %v1399_v32, %v1291_v62  ;;  %v1428_v27 = vadd.f32 %v1427_v63, %v1293_v56  ;;  %v1292_v44 = vmul.f32 %v837_v23, %v837_v23  ;;  %v965_v26 = vpop.f32.mrb[56].mxu1 }
 0x171   : > { %v1294_v11 = vmul.f32 %v948_v14, %v948_v14  ;;  %v1299_v6 = vmul.f32 %v839_v1, %v839_v1  ;;  %v1301_v15 = vmul.f32 %v950_v53, %v950_v53  ;;  %v841_v22 = vadd.f32 %v840_v25, %v2306_v47  ;;  %v967_v56 = vpop.f32.mrb[57].mxu1  ;;  %p1926_p3 = pnand %p1925_p2, %p2123_p4 }
 0x172   : > { %v1414_v7 = vadd.f32 %v1413_v10, %v1292_v44  ;;  %v952_v9 = vadd.f32 %v951_v31, %v2306_v47  ;;  %v845_v35 = vadd.f32 %v844_v8, %v2308_v48  ;;  %v956_v41 = vadd.f32 %v955_v40, %v2308_v48  ;;  %v854_v31 = vpop.f32.mrb[56].mxu0  ;;  %v969_v1 = vpop.f32.mrb[58].mxu1 }
 0x173   : > { %v1442_v39 = vadd.f32 %v1441_v5, %v1294_v11  ;;  %v1401_v34 = vadd.f32 %v1400_v33, %v1299_v6  ;;  %v1429_v29 = vadd.f32 %v1428_v27, %v1301_v15  ;;  %v1300_v42 = vmul.f32 %v841_v22, %v841_v22  ;;  %v856_v30 = vpop.f32.mrb[57].mxu0  ;;  %v971_v44 = vpop.f32.mrb[59].mxu1  ;;  %p1927_p5 = pneg %p1926_p3 }
 0x174   : > { %v1302_v55 = vmul.f32 %v952_v9, %v952_v9  ;;  %v1307_v38 = vmul.f32 %v845_v35, %v845_v35  ;;  %v1309_v57 = vmul.f32 %v956_v41, %v956_v41  ;;  %v847_v32 = vadd.f32 %v846_v13, %v2308_v48  ;;  %v858_v23 = vpop.f32.mrb[58].mxu0 }
 0x175   : > { %v1415_v63 = vadd.f32 %v1414_v7, %v1300_v42  ;;  %v958_v25 = vadd.f32 %v957_v17, %v2308_v48  ;;  %v849_v3 = vadd.f32 %v848_v60, %v2310_v49  ;;  %v960_v47 = vadd.f32 %v959_v28, %v2310_v49  ;;  %v860_v53 = vpop.f32.mrb[59].mxu0 }
 0x176   : > { %v1443_v59 = vadd.f32 %v1442_v39, %v1302_v55  ;;  %v1402_v12 = vadd.f32 %v1401_v34, %v1307_v38  ;;  %v1430_v0 = vadd.f32 %v1429_v29, %v1309_v57  ;;  %v1308_v37 = vmul.f32 %v847_v32, %v847_v32  ;;  %v864_v55 = vpop.f32.mrb[60].mxu0 }
 0x177   : > { %v1310_v10 = vmul.f32 %v958_v25, %v958_v25  ;;  %v1315_v5 = vmul.f32 %v849_v3, %v849_v3  ;;  %v1317_v8 = vmul.f32 %v960_v47, %v960_v47  ;;  %v851_v62 = vadd.f32 %v850_v58, %v2310_v49 }
 0x178   : > { %v1416_v40 = vadd.f32 %v1415_v63, %v1308_v37  ;;  %v962_v48 = vadd.f32 %v961_v45, %v2310_v49  ;;  %v855_v13 = vadd.f32 %v854_v31, %v2312_v50  ;;  %v966_v14 = vadd.f32 %v965_v26, %v2312_v50  ;;  %v866_v63 = vpop.f32.mrb[61].mxu0 }
 0x179   : > { %v1444_v17 = vadd.f32 %v1443_v59, %v1310_v10  ;;  %v1403_v60 = vadd.f32 %v1402_v12, %v1315_v5  ;;  %v1431_v33 = vadd.f32 %v1430_v0, %v1317_v8  ;;  %v1316_v27 = vmul.f32 %v851_v62, %v851_v62  ;;  %v868_v0 = vpop.f32.mrb[62].mxu0 }
 0x17a   : > { %v1318_v28 = vmul.f32 %v962_v48, %v962_v48  ;;  %v1323_v11 = vmul.f32 %v855_v13, %v855_v13  ;;  %v1325_v6 = vmul.f32 %v966_v14, %v966_v14  ;;  %v857_v58 = vadd.f32 %v856_v30, %v2312_v50  ;;  %v869_v5 = vpop.f32.mrb[63].mxu0 }
 0x17b   : > { %v1417_v15 = vadd.f32 %v1416_v40, %v1316_v27  ;;  %v968_v22 = vadd.f32 %v967_v56, %v2312_v50  ;;  %v859_v49 = vadd.f32 %v858_v23, %v2314_v51  ;;  %v970_v45 = vadd.f32 %v969_v1, %v2314_v51  ;;  %v975_v50 = vpop.f32.mrb[60].mxu1 }
 0x17c   : > { %v1445_v7 = vadd.f32 %v1444_v17, %v1318_v28  ;;  %v1404_v9 = vadd.f32 %v1403_v60, %v1323_v11  ;;  %v1432_v35 = vadd.f32 %v1431_v33, %v1325_v6  ;;  %v1324_v41 = vmul.f32 %v857_v58, %v857_v58  ;;  %v977_v12 = vpop.f32.mrb[61].mxu1 }
 0x17d   : > { %v1326_v39 = vmul.f32 %v968_v22, %v968_v22  ;;  %v1331_v34 = vmul.f32 %v859_v49, %v859_v49  ;;  %v1333_v29 = vmul.f32 %v970_v45, %v970_v45  ;;  %v861_v42 = vadd.f32 %v860_v53, %v2314_v51  ;;  %v979_v10 = vpop.f32.mrb[62].mxu1 }
 0x17e   : > { %v1418_v38 = vadd.f32 %v1417_v15, %v1324_v41  ;;  %v972_v57 = vadd.f32 %v971_v44, %v2314_v51  ;;  %v865_v32 = vadd.f32 %v864_v55, %v2320_v54  ;;  %v1244_v25 = vrot.slane %v1222_v20, %v2338_v18  ;;  %v980_v2 = vpop.f32.mrb[63].mxu1 }
 0x17f   : > { %v1446_v3 = vadd.f32 %v1445_v7, %v1326_v39  ;;  %v1405_v47 = vadd.f32 %v1404_v9, %v1331_v34  ;;  %v1433_v31 = vadd.f32 %v1432_v35, %v1333_v29  ;;  %v1332_v59 = vmul.f32 %v861_v42, %v861_v42 }
 0x180   : > { %v1334_v37 = vmul.f32 %v972_v57, %v972_v57  ;;  %v1339_v26 = vmul.f32 %v865_v32, %v865_v32  ;;  %v976_v51 = vadd.f32 %v975_v50, %v2320_v54  ;;  %v867_v30 = vadd.f32 %v866_v63, %v2320_v54 }
 0x181   : > { %v1419_v8 = vadd.f32 %v1418_v38, %v1332_v59  ;;  %v978_v62 = vadd.f32 %v977_v12, %v2320_v54  ;;  %v1251_v61 = vrot.slane %v1223_v21, %v2338_v18  ;;  %v1260_v54 = vrot.slane %v1252_v43, %v2338_v18 }
 0x182   : > { %v1447_v20 = vadd.f32 %v1446_v3, %v1334_v37  ;;  %v1406_v56 = vadd.f32 %v1405_v47, %v1339_v26  ;;  %v1341_v23 = vmul.f32 %v976_v51, %v976_v51  ;;  %v1340_v40 = vmul.f32 %v867_v30, %v867_v30 }
 0x183   : > { %v1342_v48 = vmul.f32 %v978_v62, %v978_v62  ;;  %v1253_v13 = vcombine.low %v1244_v25, %v1251_v61  ;;  %v1503_v50 = vrot.slane %v1495_v36, %v2338_v18 }
 0x184   : > { %v1407_v14 = vrot.slane %v1406_v56, 4  ;;  %v1434_v1 = vadd.f32 %v1433_v31, %v1341_v23  ;;  %v1420_v53 = vadd.f32 %v1419_v8, %v1340_v40 }
 0x185   : > { %v1448_v17 = vadd.f32 %v1447_v20, %v1342_v48  ;;  %v1267_v46 = vrot.slane %v1253_v13, %v2338_v18 }
 0x186   : > { %v1408_v19 = vadd.f32 %v1407_v14, %v1406_v56  ;;  %v1435_v21 = vrot.slane %v1434_v1, 4  ;;  %v1421_v60 = vrot.slane %v1420_v53, 4 }
 0x187   : > { %v1449_v33 = vrot.slane %v1448_v17, 4  ;;  %v1268_v27 = vcombine.low %v1260_v54, %v1267_v46 }
 0x188   : > { %v1409_v44 = vrot.slane %v1408_v19, 2  ;;  %v1436_v28 = vadd.f32 %v1435_v21, %v1434_v1  ;;  %v1422_v11 = vadd.f32 %v1421_v60, %v1420_v53 }
 0x189   : > { %v1450_v6 = vadd.f32 %v1449_v33, %v1448_v17  ;;  %1270 = vst [vmem:[%s2629_s19] sm:$0xff] %v1268_v27  ;;  %s1928_s19 = sshll.u32 %s2041_s15, 4  ;;  %s1929_s19 = int_to_ptr.vmem [resolvable:$false] %s1928_s19 }
 0x18a   : > { %v1410_v58 = vadd.f32 %v1409_v44, %v1408_v19  ;;  %v1437_v15 = vrot.slane %v1436_v28, 2  ;;  %v1423_v24 = vrot.slane %v1422_v11, 2  ;;  %s1930_s17 = scalar_lea.vmem %s1929_s19, 256  ;;  %p1931_p6 = scmp.lt.s32.totalorder %s2652_s14, %s1929_s19 }
 0x18b   : > { %v1451_v4 = vrot.slane %v1450_v6, 2  ;;  %p1932_p7 = scmp.lt.s32.totalorder %s1930_s17, %s1924_s7 }
 0x18c   : > { %v1411_v43 = vrot.slane %v1410_v58, 1  ;;  %v1438_v22 = vadd.f32 %v1437_v15, %v1436_v28  ;;  %v1424_v49 = vadd.f32 %v1423_v24, %v1422_v11 }
 0x18d   : > { %v1452_v45 = vadd.f32 %v1451_v4, %v1450_v6  ;;  %p1933_p9 = por %p1932_p7, %p1931_p6 }
 0x18e   : > { %v1412_v7 = vadd.f32 %v1411_v43, %v1410_v58  ;;  %v1439_v9 = vrot.slane %v1438_v22, 1  ;;  %v1425_v35 = vrot.slane %v1424_v49, 1 }
 0x18f   : > { %v1453_v41 = vrot.slane %v1452_v45, 1  ;;  %p1934_p10 = pnand %p1933_p9, %p1927_p5 }
 0x190   : > { %v1440_v39 = vadd.f32 %v1439_v9, %v1438_v22  ;;  %v1426_v34 = vadd.f32 %v1425_v35, %v1424_v49 }
 0x191   : > { %v1454_v29 = vadd.f32 %v1453_v41, %v1452_v45 }
 0x192   : > { %v1465_v42 = vcombine.low %v1412_v7, %v1426_v34 }
 0x193   : > { %v1466_v55 = vcombine.low %v1440_v39, %v1454_v29 }
 0x194   : > { %v1487_v38 = vrot.slane %v1465_v42, %v2338_v18 }
 0x195   : > { %v1494_v57 = vrot.slane %v1466_v55, %v2338_v18 }
 0x197   : > { %v1496_v32 = vcombine.low %v1487_v38, %v1494_v57 }
 0x199   : > { %v1510_v63 = vrot.slane %v1496_v32, %v2338_v18 }
 0x19b   : > { %v1511_v25 = vcombine.low %v1503_v50, %v1510_v63 }
 0x19d   : > { %1513 = vst [vmem:[%s285_s13] sm:$0xff] %v1511_v25 }
 0x19e   : > { %1937 = shalt.err (!%p1934_p10)
}
 0x19f   : > { %s1938_s9 = scalar_lea.hbm %s2650_s3, 128  ;;  %s1942_s26 = scalar_lea.hbm %s2737_s5, 256 }
 0x1a0   : > { %p1939_p11 = scmp.ne.s32.totalorder %s2650_s3, %s1938_s9  ;;  %p1943_p0 = scmp.lt.u32.totalorder %s2650_s3, %s2737_s5 }
 0x1a1   : > { %p1944_p1 = scmp.lt.u32.totalorder %s1942_s26, %s1938_s9  ;;  %p1946_p3 = scmp.lt.u32.totalorder %s1938_s9, %s2650_s3 }
 0x1a2   : > { %p1940_p12 = pnand %p1939_p11, %p2123_p4 }
 0x1a3   : > { %p1945_p2 = por %p1944_p1, %p1943_p0 }
 0x1a4   : > { %p1941_p13 = pneg %p1940_p12 }
 0x1a5   : > { %p1947_p5 = por %p1946_p3, %p1945_p2 }
 0x1a7   : > { %p1948_p6 = pnand %p1947_p5, %p1941_p13 }
 0x1a9   : > { %1951 = shalt.err (!%p1948_p6)
}
 0x1aa   : > { %1818 = dma.vmem_to_hbm [thread:$0]  (%p2123_p4), %s2652_s14, 128, %s2650_s3, %s1520_s21  }
 0x1ab   : > { %s1952_s7 = scalar_lea.vmem %s2659_s16, 128  ;;  %s2042_s19 = smov [#allocation7]  }
 0x1ac   : > { %p1953_p7 = scmp.ne.s32.totalorder %s2659_s16, %s1952_s7  ;;  %s1956_s17 = sshll.u32 %s2042_s19, 4  ;;  %s1957_s17 = int_to_ptr.vmem [resolvable:$false] %s1956_s17 }
 0x1ad   : > { %s1958_s9 = scalar_lea.vmem %s1957_s17, 256  ;;  %p1959_p11 = scmp.lt.s32.totalorder %s2659_s16, %s1957_s17 }
 0x1ae   : > { %p1954_p9 = pnand %p1953_p7, %p2123_p4  ;;  %p1960_p12 = scmp.lt.s32.totalorder %s1958_s9, %s1952_s7 }
 0x1b0   : > { %p1955_p10 = pneg %p1954_p9  ;;  %p1961_p13 = por %p1960_p12, %p1959_p11 }
 0x1b2   : > { %p1962_p0 = pnand %p1961_p13, %p1955_p10 }
 0x1b4   : > { %1965 = shalt.err (!%p1962_p0)
}
 0x1b5   : > { %s1966_s14 = scalar_lea.hbm %s2657_s22, 128  ;;  %s1970_s18 = scalar_lea.hbm %s2738_s6, 256 }
 0x1b6   : > { %p1967_p1 = scmp.ne.s32.totalorder %s2657_s22, %s1966_s14  ;;  %p1971_p5 = scmp.lt.u32.totalorder %s2657_s22, %s2738_s6 }
 0x1b7   : > { %p1972_p6 = scmp.lt.u32.totalorder %s1970_s18, %s1966_s14  ;;  %p1974_p9 = scmp.lt.u32.totalorder %s1966_s14, %s2657_s22 }
 0x1b8   : > { %p1968_p2 = pnand %p1967_p1, %p2123_p4 }
 0x1b9   : > { %p1973_p7 = por %p1972_p6, %p1971_p5 }
 0x1ba   : > { %p1969_p3 = pneg %p1968_p2 }
 0x1bb   : > { %p1975_p10 = por %p1974_p9, %p1973_p7 }
 0x1bd   : > { %p1976_p11 = pnand %p1975_p10, %p1969_p3 }
 0x1bf   : > { %1979 = shalt.err (!%p1976_p11)
}
 0x1c0   : > { %1819 = dma.vmem_to_hbm [thread:$0]  (%p2123_p4), %s2659_s16, 128, %s2657_s22, %s1520_s21  }
 0x1c1 PF: > { %p1833_p12 = scmp.ge.s32.totalorder %s2034_s28, 2  ;;  %s1587_s15 = sand.u32 1, %s2014_s23  }
 0x1c2   : > { %s1588_s7 = scalar_lea.sflag [#allocation4], %s1587_s15 }
 0x1c3   : > { %p1824_p13 = pnand %p1833_p12, %p2132_p8 }
 0x1c5   : > { %2005 = dma.done.wait (!%p1824_p13), %s1588_s7, 1536  }
 0x1c6   : > { %2007 = vsyncadd (!%p1824_p13), %s1588_s7, 4294965760  ;;  %s1596_s19 = sand.u32 1, %s1719_s29  }
 0x1c7   : > { %s1597_s8 = scalar_lea.sflag [#allocation6], %s1596_s19 }
 0x1c8   : > { %2009 = dma.done.wait (!%p1824_p13), %s1597_s8, 256  }
 0x1c9   : > { %2011 = vsyncadd (!%p1824_p13), %s1597_s8, 4294967040  ;;  %s24_s28 = sadd.s32 1, %s2034_s28   ;;  %s2741_s23 = smov %s2018_s24 }
 0x1ca   : > { %p21_p4 = scmp.ge.s32.totalorder %s24_s28, 4   ;;  %s2742_s24 = smov %s2022_s25 }
 0x1cb   : > { %s2743_s25 = smov %s2138_s11  ;;  %s2744_s26 = smov %s2030_s27 }
 0x1cc   : > { %s2745_s27 = smov %s2747_s30  ;;  %23 = sbr.rel (!%p21_p4) target bundleno = 8 (0x8), region = 103 }
 0x1d3   :  { %1611 = vsyncpa [#allocation4], 1 }
 0x1d4   :  { %1613 = vsyncpa [#allocation4 + $0x1], 1 }
 0x1d5   :  { %1614 = vsyncpa [#allocation6], 1 }
 0x1d6   :  { %1616 = vsyncpa [#allocation6 + $0x1], 1 }

</bundles_post_ra>
